<compile_context>
chip_gen: v7x
topology: tpu7x:2x2x1
jax: 0.10.0
libtpu: 0.0.40
codegen_flags: <defaults>
</compile_context>

<pallas_src>
import functools

import jax
import jax.numpy as jnp
from jax.experimental import pallas as pl
from jax.experimental.pallas import tpu as pltpu


# ----------------------------- in-kernel helpers -----------------------------

def _layernorm(x, w, b, eps):
    # PyTorch nn.LayerNorm over the last dim (biased variance), f32 math.
    mu = jnp.mean(x, axis=-1, keepdims=True)
    var = jnp.mean(jnp.square(x - mu), axis=-1, keepdims=True)
    return (x - mu) * jax.lax.rsqrt(var + eps) * w + b


def _gelu_tanh(x):
    # tanh-approximation GELU (EUP path).
    # TODO(synk): PyTorch nn.GELU() default is exact erf; tanh approx differs
    # by <~1e-3 relative.
    c = 0.7978845608028654  # sqrt(2/pi)
    return 0.5 * x * (1.0 + jnp.tanh(c * (x + 0.044715 * x * x * x)))


# ----------------------------- host-side helpers ------------------------------

def _pick_tile(n, target, align):
    """Largest `align`-multiple divisor of n that is <= target, else n (full)."""
    if n <= target:
        return n
    best = None
    t = align
    while t <= target:
        if n % t == 0:
            best = t
        t += align
    return best if best is not None else n


def _nbytes(shape, itemsize):
    n = 1
    for d in shape:
        n *= int(d)
    return n * itemsize


def _compiler_params(sem, block_bytes, scratch_bytes=0):
    """Explicit scoped-VMEM budget from the actual blocks (x2 for double
    buffering) + headroom; floor 32 MiB (default), cap 64 MiB (v7x physical)."""
    est = 2 * block_bytes + scratch_bytes + (4 << 20)
    return pltpu.CompilerParams(
        dimension_semantics=sem,
        vmem_limit_bytes=int(min(max(est, 32 << 20), 64 << 20)))


def _row_tile_and_pad(x2, target=512):
    """Pick a token-row tile and zero-pad rows up to a tile multiple."""
    M = x2.shape[0]
    TM = M if M <= target else target
    Mp = ((M + TM - 1) // TM) * TM
    if Mp != M:
        x2 = jnp.pad(x2, ((0, Mp - M), (0, 0)))
    return x2, TM, Mp, M


# ----------------------------- Pallas kernels --------------------------------

def qkv_kernel(x_ref, ln1w_ref, ln1b_ref, wqkv_ref, bqkv_ref,
               q_ref, k_ref, v_ref, *, eps):
    """Q/K/V = LN1(x) @ W_QKV^T + b for one (batch, seq-tile) block."""
    x = x_ref[0]                                   # (TS, H) f32
    H = x.shape[-1]
    xn = _layernorm(x, ln1w_ref[...], ln1b_ref[...], eps)
    qkv = jnp.dot(xn.astype(jnp.bfloat16), wqkv_ref[...],
                  preferred_element_type=jnp.float32) + bqkv_ref[...]
    q_ref[0] = qkv[:, :H].astype(jnp.bfloat16)
    k_ref[0] = qkv[:, H:2 * H].astype(jnp.bfloat16)
    v_ref[0] = qkv[:, 2 * H:].astype(jnp.bfloat16)


def flash_attn_kernel(x_ref, q_ref, k_ref, v_ref, wo_ref, bo_ref, out_ref,
                      m_sc, l_sc, acc_sc, attn_sc, *, num_heads):
    """Flash-style causal attention + W_O projection + residual.

    Grid: (batch, q-tile, kv-tile); kv is the innermost ("arbitrary") axis.
    Scratch: m/l per head (TQ, nh) f32, acc (TQ, H) f32, attn (TQ, H) bf16.
    """
    qi = pl.program_id(1)
    ki = pl.program_id(2)
    TQ = q_ref.shape[1]
    TKV = k_ref.shape[1]
    H = q_ref.shape[2]
    hd = H // num_heads
    scale = 1.0 / (hd ** 0.5)

    @pl.when(ki == 0)
    def _():
        m_sc[...] = jnp.full(m_sc.shape, -1e30, dtype=m_sc.dtype)
        l_sc[...] = jnp.zeros(l_sc.shape, dtype=l_sc.dtype)
        acc_sc[...] = jnp.zeros(acc_sc.shape, dtype=acc_sc.dtype)

    q_start = qi * TQ
    k_start = ki * TKV

    # Skip kv tiles that are entirely above the causal diagonal.
    @pl.when(k_start <= q_start + TQ - 1)
    def _():
        q = q_ref[0]                               # (TQ, H) bf16
        k = k_ref[0]                               # (TKV, H) bf16
        v = v_ref[0]                               # (TKV, H) bf16
        # Causal mask for this (q, kv) tile, computed once (not per head).
        q_idx = q_start + jax.lax.broadcasted_iota(jnp.int32, (TQ, TKV), 0)
        k_idx = k_start + jax.lax.broadcasted_iota(jnp.int32, (TQ, TKV), 1)
        causal = q_idx >= k_idx
        neg = jnp.float32(-1000000.0)              # matches PyTorch reference
        for h in range(num_heads):                 # static unrolled head loop
            sl = slice(h * hd, (h + 1) * hd)
            s = jax.lax.dot_general(q[:, sl], k[:, sl],
                                    (((1,), (1,)), ((), ())),
                                    preferred_element_type=jnp.float32) * scale
            s = jnp.where(causal, s, neg)
            m_prev = m_sc[:, h:h + 1]
            l_prev = l_sc[:, h:h + 1]
            m_new = jnp.maximum(m_prev, jnp.max(s, axis=-1, keepdims=True))
            alpha = jnp.exp(m_prev - m_new)
            p = jnp.exp(s - m_new)                 # f32 softmax numerators
            l_sc[:, h:h + 1] = alpha * l_prev + jnp.sum(p, axis=-1, keepdims=True)
            acc_sc[:, sl] = alpha * acc_sc[:, sl] + jnp.dot(
                p.astype(jnp.bfloat16), v[:, sl],
                preferred_element_type=jnp.float32)
            m_sc[:, h:h + 1] = m_new

    @pl.when(ki == pl.num_programs(2) - 1)
    def _():
        # Normalize each head into the bf16 scratch (no concatenate), then one
        # full-K output projection and the residual add.
        for h in range(num_heads):
            sl = slice(h * hd, (h + 1) * hd)
            inv = pl.reciprocal(l_sc[:, h:h + 1], approx=True)
            attn_sc[:, sl] = (acc_sc[:, sl] * inv).astype(jnp.bfloat16)
        proj = jnp.dot(attn_sc[...], wo_ref[...],
                       preferred_element_type=jnp.float32) + bo_ref[...]
        out_ref[0] = x_ref[0] + proj               # dropout (eval) == identity


def mlp_block_kernel(x_ref, ln2w_ref, ln2b_ref, fc1w_ref, fc1b_ref,
                     fc2w_ref, fc2b_ref, out_ref, xn_sc, acc_sc, *, eps):
    """x_out = x + fc2(gelu(fc1(LN2(x)))), 4H dim tiled over grid axis 1."""
    f = pl.program_id(1)

    @pl.when(f == 0)
    def _():
        x = x_ref[...]                             # (TM, H) f32
        xn_sc[...] = _layernorm(x, ln2w_ref[...], ln2b_ref[...],
                                eps).astype(jnp.bfloat16)
        acc_sc[...] = x + fc2b_ref[...]            # residual + fc2 bias

    h1 = jnp.dot(xn_sc[...], fc1w_ref[...],
                 preferred_element_type=jnp.float32) + fc1b_ref[...]
    h1 = _gelu_tanh(h1)                            # f32, per-element => tileable
    acc_sc[...] += jnp.dot(h1.astype(jnp.bfloat16), fc2w_ref[...],
                           preferred_element_type=jnp.float32)

    @pl.when(f == pl.num_programs(1) - 1)
    def _():
        out_ref[...] = acc_sc[...]                 # dropout (eval) == identity


def final_kernel(x_ref, lnw_ref, lnb_ref, wembt_ref, out_ref, xn_sc, *, eps):
    """logits tile = LN_f(x) @ W_emb^T; LN + bf16 cast done once per token tile."""
    @pl.when(pl.program_id(1) == 0)
    def _():
        xn_sc[...] = _layernorm(x_ref[...], lnw_ref[...], lnb_ref[...],
                                eps).astype(jnp.bfloat16)
    out_ref[...] = jnp.dot(xn_sc[...], wembt_ref[...],
                           preferred_element_type=jnp.float32).astype(jnp.bfloat16)


# ----------------------------- wrappers ---------------------------------------

def run_qkv(x, blk, eps):
    B, S, H = x.shape
    TS = _pick_tile(S, 512, 8)
    in_specs = [
        pl.BlockSpec((1, TS, H), lambda b, s: (b, s, 0)),     # x tile
        pl.BlockSpec((1, H), lambda b, s: (0, 0)),            # ln1_w
        pl.BlockSpec((1, H), lambda b, s: (0, 0)),            # ln1_b
        pl.BlockSpec((H, 3 * H), lambda b, s: (0, 0)),        # W_QKV^T (bf16)
        pl.BlockSpec((1, 3 * H), lambda b, s: (0, 0)),        # b_QKV
    ]
    out_specs = [pl.BlockSpec((1, TS, H), lambda b, s: (b, s, 0))
                 for _ in range(3)]
    out_shape = tuple(jax.ShapeDtypeStruct((B, S, H), jnp.bfloat16)
                      for _ in range(3))
    blk_bytes = (_nbytes((1, TS, H), 4) + 2 * _nbytes((1, H), 4)
                 + _nbytes((H, 3 * H), 2) + _nbytes((1, 3 * H), 4)
                 + 3 * _nbytes((1, TS, H), 2))
    q, k, v = pl.pallas_call(
        functools.partial(qkv_kernel, eps=eps),
        out_shape=out_shape,
        grid=(B, S // TS),
        in_specs=in_specs,
        out_specs=out_specs,
        compiler_params=_compiler_params(("parallel", "parallel"), blk_bytes),
    )(x, blk['ln1_w'], blk['ln1_b'], blk['wqkv_t'], blk['bqkv'])
    return q, k, v


def run_flash_attn(x, q, k, v, blk, num_heads, eps):
    del eps  # LayerNorm already applied in the qkv kernel
    B, S, H = x.shape
    TQ = _pick_tile(S, 512, 8)
    # kv tile aligned to 128 lanes (256 target feeds the 256-wide MXU on v6e/v7x);
    # falls back to full S when S has no aligned divisor.
    TKV = _pick_tile(S, 256, 128)
    in_specs = [
        pl.BlockSpec((1, TQ, H), lambda b, qi, ki: (b, qi, 0)),   # x residual f32
        pl.BlockSpec((1, TQ, H), lambda b, qi, ki: (b, qi, 0)),   # q bf16
        pl.BlockSpec((1, TKV, H), lambda b, qi, ki: (b, ki, 0)),  # k bf16
        pl.BlockSpec((1, TKV, H), lambda b, qi, ki: (b, ki, 0)),  # v bf16
        pl.BlockSpec((H, H), lambda b, qi, ki: (0, 0)),           # W_O^T bf16
        pl.BlockSpec((1, H), lambda b, qi, ki: (0, 0)),           # b_O f32
    ]
    scratch = [
        pltpu.VMEM((TQ, num_heads), jnp.float32),   # running max per head
        pltpu.VMEM((TQ, num_heads), jnp.float32),   # running sum per head
        pltpu.VMEM((TQ, H), jnp.float32),           # unnormalized P@V accumulator
        pltpu.VMEM((TQ, H), jnp.bfloat16),          # normalized heads (W_O input)
    ]
    blk_bytes = (2 * _nbytes((1, TQ, H), 4) + _nbytes((1, TQ, H), 2)
                 + 2 * _nbytes((1, TKV, H), 2)
                 + _nbytes((H, H), 2) + _nbytes((1, H), 4))
    scr_bytes = (2 * _nbytes((TQ, num_heads), 4)
                 + _nbytes((TQ, H), 4) + _nbytes((TQ, H), 2))
    return pl.pallas_call(
        functools.partial(flash_attn_kernel, num_heads=num_heads),
        out_shape=jax.ShapeDtypeStruct((B, S, H), jnp.float32),
        grid=(B, S // TQ, S // TKV),
        in_specs=in_specs,
        out_specs=pl.BlockSpec((1, TQ, H), lambda b, qi, ki: (b, qi, 0)),
        scratch_shapes=scratch,
        input_output_aliases={0: 0},     # residual written in place
        compiler_params=_compiler_params(
            ("parallel", "parallel", "arbitrary"), blk_bytes, scr_bytes),
    )(x, q, k, v, blk['wo_t'], blk['bo'])


def run_mlp(x, blk, eps):
    B, S, H = x.shape
    x2, TM, Mp, M = _row_tile_and_pad(x.reshape(B * S, H), target=512)
    F4 = 4 * H
    TF = _pick_tile(F4, 1024, 128)       # stream fc1/fc2 weights per 4H tile
    in_specs = [
        pl.BlockSpec((TM, H), lambda m, f: (m, 0)),     # x tile (f32)
        pl.BlockSpec((1, H), lambda m, f: (0, 0)),      # ln2_w
        pl.BlockSpec((1, H), lambda m, f: (0, 0)),      # ln2_b
        pl.BlockSpec((H, TF), lambda m, f: (0, f)),     # fc1^T tile (bf16)
        pl.BlockSpec((1, TF), lambda m, f: (0, f)),     # fc1 bias tile
        pl.BlockSpec((TF, H), lambda m, f: (f, 0)),     # fc2^T tile (bf16)
        pl.BlockSpec((1, H), lambda m, f: (0, 0)),      # fc2 bias
    ]
    scratch = [
        pltpu.VMEM((TM, H), jnp.bfloat16),   # LN2(x) cached per token tile
        pltpu.VMEM((TM, H), jnp.float32),    # f32 accumulator (residual + fc2 out)
    ]
    blk_bytes = (2 * _nbytes((TM, H), 4)
                 + _nbytes((H, TF), 2) + _nbytes((TF, H), 2)
                 + _nbytes((1, TF), 4) + 3 * _nbytes((1, H), 4))
    scr_bytes = _nbytes((TM, H), 2) + _nbytes((TM, H), 4)
    out = pl.pallas_call(
        functools.partial(mlp_block_kernel, eps=eps),
        out_shape=jax.ShapeDtypeStruct((Mp, H), jnp.float32),
        grid=(Mp // TM, F4 // TF),
        in_specs=in_specs,
        out_specs=pl.BlockSpec((TM, H), lambda m, f: (m, 0)),
        scratch_shapes=scratch,
        input_output_aliases={0: 0},     # residual written in place
        compiler_params=_compiler_params(("parallel", "arbitrary"),
                                         blk_bytes, scr_bytes),
    )(x2, blk['ln2_w'], blk['ln2_b'], blk['fc1w_t'], blk['fc1b'],
      blk['fc2w_t'], blk['fc2b'])
    return out[:M].reshape(B, S, H)


def run_final(x, ln_w, ln_b, wemb_t, eps):
    B, S, H = x.shape
    x2, TM, Mp, M = _row_tile_and_pad(x.reshape(B * S, H), target=512)
    V = wemb_t.shape[1]
    TV = _pick_tile(V, 1024, 128)
    Vp, wt = V, wemb_t
    if V > 1024 and TV == V:
        # No lane-aligned vocab tile: pad the vocab dim to a 128 multiple.
        # TODO(synk): for production, pad the tied embedding once at init.
        Vp = ((V + 127) // 128) * 128
        wt = jnp.pad(wemb_t, ((0, 0), (0, Vp - V)))
        TV = _pick_tile(Vp, 1024, 128)
    in_specs = [
        pl.BlockSpec((TM, H), lambda m, v: (m, 0)),      # x tile (f32)
        pl.BlockSpec((1, H), lambda m, v: (0, 0)),       # ln_f w
        pl.BlockSpec((1, H), lambda m, v: (0, 0)),       # ln_f b
        pl.BlockSpec((H, TV), lambda m, v: (0, v)),      # W_emb^T tile (bf16)
    ]
    blk_bytes = (_nbytes((TM, H), 4) + 2 * _nbytes((1, H), 4)
                 + _nbytes((H, TV), 2) + _nbytes((TM, TV), 2))
    scr_bytes = _nbytes((TM, H), 2)
    out = pl.pallas_call(
        functools.partial(final_kernel, eps=eps),
        out_shape=jax.ShapeDtypeStruct((Mp, Vp), jnp.bfloat16),   # bf16 logits
        grid=(Mp // TM, Vp // TV),
        in_specs=in_specs,
        out_specs=pl.BlockSpec((TM, TV), lambda m, v: (m, v)),
        scratch_shapes=[pltpu.VMEM((TM, H), jnp.bfloat16)],
        compiler_params=_compiler_params(("parallel", "arbitrary"),
                                         blk_bytes, scr_bytes),
    )(x2, ln_w, ln_b, wt)
    return out[:M, :V].reshape(B, S, V)


def gpt_forward(tokens, params, cfg):
    if tokens.ndim == 1:
        tokens = tokens[None, :]
    B, S = tokens.shape
    eps = cfg['layer_norm_epsilon']
    pos = jnp.arange(S, dtype=jnp.int32)
    # glue: embedding gather in plain JAX; dropout (eval) == identity
    x = params['token_emb'][tokens] + params['pos_emb'][pos][None, :, :]
    for blk in params['blocks']:
        q, k, v = run_qkv(x, blk, eps)
        x = run_flash_attn(x, q, k, v, blk, cfg['num_heads'], eps)
        x = run_mlp(x, blk, eps)
    return run_final(x, params['ln_f_w'], params['ln_f_b'],
                     params['wemb_t'], eps)        # (B, S, V) bf16 logits


# ----------------------------- deterministic params ---------------------------

def init_params(key, cfg):
    H = cfg['hidden_size']
    V = cfg['vocab_size']
    L = cfg['num_layers']
    Mx = cfg['max_seq_len']
    keys = jax.random.split(key, 2 + L)
    token_emb = 0.02 * jax.random.normal(keys[0], (V, H), jnp.float32)
    params = {
        'token_emb': token_emb,                              # f32 for gather
        'wemb_t': token_emb.T.astype(jnp.bfloat16),          # (H, V) tied logits
        'pos_emb': 0.02 * jax.random.normal(keys[1], (Mx, H), jnp.float32),
        'ln_f_w': jnp.ones((1, H), jnp.float32),
        'ln_f_b': jnp.zeros((1, H), jnp.float32),
        'blocks': [],
    }
    for i in range(L):
        bk = jax.random.split(keys[2 + i], 8)
        wqkv = 0.02 * jax.random.normal(bk[0], (3 * H, H), jnp.float32)
        wo = 0.02 * jax.random.normal(bk[2], (H, H), jnp.float32)
        fc1 = 0.02 * jax.random.normal(bk[4], (4 * H, H), jnp.float32)
        fc2 = 0.02 * jax.random.normal(bk[6], (H, 4 * H), jnp.float32)
        params['blocks'].append({
            'ln1_w': jnp.ones((1, H), jnp.float32),
            'ln1_b': jnp.zeros((1, H), jnp.float32),
            'wqkv_t': wqkv.T.astype(jnp.bfloat16),           # (H, 3H)
            'bqkv': 0.01 * jax.random.normal(bk[1], (1, 3 * H), jnp.float32),
            'wo_t': wo.T.astype(jnp.bfloat16),               # (H, H)
            'bo': 0.01 * jax.random.normal(bk[3], (1, H), jnp.float32),
            'ln2_w': jnp.ones((1, H), jnp.float32),
            'ln2_b': jnp.zeros((1, H), jnp.float32),
            'fc1w_t': fc1.T.astype(jnp.bfloat16),            # (H, 4H)
            'fc1b': 0.01 * jax.random.normal(bk[5], (1, 4 * H), jnp.float32),
            'fc2w_t': fc2.T.astype(jnp.bfloat16),            # (4H, H)
            'fc2b': 0.01 * jax.random.normal(bk[7], (1, H), jnp.float32),
        })
    return params


# ----------------------------- main --------------------------------------------

if __name__ == "__main__":
    cfg = dict(
        vocab_size=64,
        hidden_size=32,
        num_heads=4,
        num_layers=2,
        max_seq_len=16,
        layer_norm_epsilon=1e-5,
        dropout=0.0,   # TODO(synk): dropout is identity in eval mode; not modeled.
    )
    key = jax.random.PRNGKey(0)
    pkey, tkey = jax.random.split(key)
    params = init_params(pkey, cfg)

    batch, seq = 2, 8
    tokens = jax.random.randint(tkey, (batch, seq), 0, cfg['vocab_size'],
                                dtype=jnp.int32)

    @jax.jit
    def fwd(toks):
        return gpt_forward(toks, params, cfg)

    logits = fwd(tokens)               # (batch, seq, vocab) bf16
    jax.block_until_ready(logits)
    assert logits.shape == (batch, seq, cfg['vocab_size'])
    print("KERNEL_OK")
</pallas_src>

<mosaic_0001>
module attributes {stable_mosaic.version = 11 : i64} {
  func.func @mlp_block_kernel(%arg0: i32, %arg1: i32, %arg2: memref<16x32xf32, #tpu.memory_space<vmem>>, %arg3: memref<1x32xf32, #tpu.memory_space<vmem>>, %arg4: memref<1x32xf32, #tpu.memory_space<vmem>>, %arg5: memref<32x128xbf16, #tpu.memory_space<vmem>>, %arg6: memref<1x128xf32, #tpu.memory_space<vmem>>, %arg7: memref<128x32xbf16, #tpu.memory_space<vmem>>, %arg8: memref<1x32xf32, #tpu.memory_space<vmem>>, %arg9: memref<16x32xf32, #tpu.memory_space<vmem>>, %arg10: memref<16x32xbf16, #tpu.memory_space<vmem>>, %arg11: memref<16x32xf32, #tpu.memory_space<vmem>>) attributes {dimension_semantics = [#tpu.dimension_semantics<parallel>, #tpu.dimension_semantics<arbitrary>], iteration_bounds = array<i64: 1, 1>, scalar_prefetch = 0 : i64, scratch_operands = 2 : i64, tpu.core_type = #tpu.core_type<tc>, window_params = [{transform_indices = @transform_0, window_bounds = array<i64: 16, 32>}, {pipeline_mode = #tpu.pipeline_mode<synchronous>, transform_indices = @transform_1, window_bounds = array<i64: 1, 32>}, {pipeline_mode = #tpu.pipeline_mode<synchronous>, transform_indices = @transform_2, window_bounds = array<i64: 1, 32>}, {transform_indices = @transform_3, window_bounds = array<i64: 32, 128>}, {transform_indices = @transform_4, window_bounds = array<i64: 1, 128>}, {transform_indices = @transform_5, window_bounds = array<i64: 128, 32>}, {pipeline_mode = #tpu.pipeline_mode<synchronous>, transform_indices = @transform_6, window_bounds = array<i64: 1, 32>}, {transform_indices = @transform_7, window_bounds = array<i64: 16, 32>}]} {
    %c0_i32 = arith.constant 0 : i32
    %0 = arith.cmpi eq, %arg1, %c0_i32 : i32
    %1 = arith.extui %0 : i1 to i32
    %c0_i32_0 = arith.constant 0 : i32
    %2 = arith.cmpi ne, %1, %c0_i32_0 : i32
    scf.if %2 {
      %c0_19 = arith.constant 0 : index
      %c0_20 = arith.constant 0 : index
      %31 = vector.load %arg2[%c0_19, %c0_20] : memref<16x32xf32, #tpu.memory_space<vmem>>, vector<16x32xf32>
      %c0_21 = arith.constant 0 : index
      %c0_22 = arith.constant 0 : index
      %32 = vector.load %arg3[%c0_21, %c0_22] : memref<1x32xf32, #tpu.memory_space<vmem>>, vector<1x32xf32>
      %c0_23 = arith.constant 0 : index
      %c0_24 = arith.constant 0 : index
      %33 = vector.load %arg4[%c0_23, %c0_24] : memref<1x32xf32, #tpu.memory_space<vmem>>, vector<1x32xf32>
      %cst_25 = arith.constant dense<0.000000e+00> : vector<16xf32>
      %34 = vector.multi_reduction <add>, %31, %cst_25 [1] : vector<16x32xf32> to vector<16xf32>
      %35 = vector.shape_cast %34 : vector<16xf32> to vector<16x1xf32>
      %cst_26 = arith.constant 3.200000e+01 : f32
      %36 = vector.broadcast %cst_26 : f32 to vector<16x1xf32>
      %37 = arith.divf %35, %36 : vector<16x1xf32>
      %38 = vector.broadcast %37 : vector<16x1xf32> to vector<16x32xf32>
      %39 = arith.subf %31, %38 : vector<16x32xf32>
      %40 = arith.mulf %39, %39 : vector<16x32xf32>
      %cst_27 = arith.constant dense<0.000000e+00> : vector<16xf32>
      %41 = vector.multi_reduction <add>, %40, %cst_27 [1] : vector<16x32xf32> to vector<16xf32>
      %42 = vector.shape_cast %41 : vector<16xf32> to vector<16x1xf32>
      %cst_28 = arith.constant 3.200000e+01 : f32
      %43 = vector.broadcast %cst_28 : f32 to vector<16x1xf32>
      %44 = arith.divf %42, %43 : vector<16x1xf32>
      %45 = vector.broadcast %37 : vector<16x1xf32> to vector<16x32xf32>
      %46 = arith.subf %31, %45 : vector<16x32xf32>
      %cst_29 = arith.constant 9.99999974E-6 : f32
      %47 = vector.broadcast %cst_29 : f32 to vector<16x1xf32>
      %48 = arith.addf %44, %47 : vector<16x1xf32>
      %49 = math.rsqrt %48 : vector<16x1xf32>
      %50 = vector.broadcast %49 : vector<16x1xf32> to vector<16x32xf32>
      %51 = arith.mulf %46, %50 : vector<16x32xf32>
      %52 = vector.broadcast %32 : vector<1x32xf32> to vector<16x32xf32>
      %53 = arith.mulf %51, %52 : vector<16x32xf32>
      %54 = vector.broadcast %33 : vector<1x32xf32> to vector<16x32xf32>
      %55 = arith.addf %53, %54 : vector<16x32xf32>
      %56 = arith.truncf %55 : vector<16x32xf32> to vector<16x32xbf16>
      %c0_30 = arith.constant 0 : index
      %c0_31 = arith.constant 0 : index
      %57 = vector.load %arg10[%c0_30, %c0_31] : memref<16x32xbf16, #tpu.memory_space<vmem>>, vector<16x32xbf16>
      tpu.vector_store %arg10[%c0_30, %c0_31], %56 {strides = array<i32>} : memref<16x32xbf16, #tpu.memory_space<vmem>>, vector<16x32xbf16>,
      %c0_32 = arith.constant 0 : index
      %c0_33 = arith.constant 0 : index
      %58 = vector.load %arg8[%c0_32, %c0_33] : memref<1x32xf32, #tpu.memory_space<vmem>>, vector<1x32xf32>
      %59 = vector.broadcast %58 : vector<1x32xf32> to vector<16x32xf32>
      %60 = arith.addf %31, %59 : vector<16x32xf32>
      %c0_34 = arith.constant 0 : index
      %c0_35 = arith.constant 0 : index
      %61 = vector.load %arg11[%c0_34, %c0_35] : memref<16x32xf32, #tpu.memory_space<vmem>>, vector<16x32xf32>
      tpu.vector_store %arg11[%c0_34, %c0_35], %60 {strides = array<i32>} : memref<16x32xf32, #tpu.memory_space<vmem>>, vector<16x32xf32>,
    } else {
    }
    %c0 = arith.constant 0 : index
    %c0_1 = arith.constant 0 : index
    %3 = vector.load %arg10[%c0, %c0_1] : memref<16x32xbf16, #tpu.memory_space<vmem>>, vector<16x32xbf16>
    %c0_2 = arith.constant 0 : index
    %c0_3 = arith.constant 0 : index
    %4 = vector.load %arg5[%c0_2, %c0_3] : memref<32x128xbf16, #tpu.memory_space<vmem>>, vector<32x128xbf16>
    %cst = arith.constant dense<0.000000e+00> : vector<16x128xf32>
    %5 = tpu.matmul %3, %4, %cst {dimension_numbers = #tpu.dot_dimension_numbers<[1], [0], [0], [1], [0, 0, 1, 1], [], []>} : vector<16x32xbf16>, vector<32x128xbf16>, vector<16x128xf32> -> vector<16x128xf32>
    %c0_4 = arith.constant 0 : index
    %c0_5 = arith.constant 0 : index
    %6 = vector.load %arg6[%c0_4, %c0_5] : memref<1x128xf32, #tpu.memory_space<vmem>>, vector<1x128xf32>
    %7 = vector.broadcast %6 : vector<1x128xf32> to vector<16x128xf32>
    %8 = arith.addf %5, %7 : vector<16x128xf32>
    %cst_6 = arith.constant 5.000000e-01 : f32
    %9 = vector.broadcast %cst_6 : f32 to vector<16x128xf32>
    %10 = arith.mulf %9, %8 : vector<16x128xf32>
    %cst_7 = arith.constant 4.471500e-02 : f32
    %11 = vector.broadcast %cst_7 : f32 to vector<16x128xf32>
    %12 = arith.mulf %11, %8 : vector<16x128xf32>
    %13 = arith.mulf %12, %8 : vector<16x128xf32>
    %14 = arith.mulf %13, %8 : vector<16x128xf32>
    %15 = arith.addf %8, %14 : vector<16x128xf32>
    %cst_8 = arith.constant 0.797884583 : f32
    %16 = vector.broadcast %cst_8 : f32 to vector<16x128xf32>
    %17 = arith.mulf %16, %15 : vector<16x128xf32>
    %18 = math.tanh %17 : vector<16x128xf32>
    %cst_9 = arith.constant 1.000000e+00 : f32
    %19 = vector.broadcast %cst_9 : f32 to vector<16x128xf32>
    %20 = arith.addf %19, %18 : vector<16x128xf32>
    %21 = arith.mulf %10, %20 : vector<16x128xf32>
    %c0_10 = arith.constant 0 : index
    %c0_11 = arith.constant 0 : index
    %22 = vector.load %arg11[%c0_10, %c0_11] : memref<16x32xf32, #tpu.memory_space<vmem>>, vector<16x32xf32>
    %23 = arith.truncf %21 : vector<16x128xf32> to vector<16x128xbf16>
    %c0_12 = arith.constant 0 : index
    %c0_13 = arith.constant 0 : index
    %24 = vector.load %arg7[%c0_12, %c0_13] : memref<128x32xbf16, #tpu.memory_space<vmem>>, vector<128x32xbf16>
    %cst_14 = arith.constant dense<0.000000e+00> : vector<16x32xf32>
    %25 = tpu.matmul %23, %24, %cst_14 {dimension_numbers = #tpu.dot_dimension_numbers<[1], [0], [0], [1], [0, 0, 1, 1], [], []>} : vector<16x128xbf16>, vector<128x32xbf16>, vector<16x32xf32> -> vector<16x32xf32>
    %26 = arith.addf %22, %25 : vector<16x32xf32>
    %c0_15 = arith.constant 0 : index
    %c0_16 = arith.constant 0 : index
    %27 = vector.load %arg11[%c0_15, %c0_16] : memref<16x32xf32, #tpu.memory_space<vmem>>, vector<16x32xf32>
    tpu.vector_store %arg11[%c0_15, %c0_16], %26 {strides = array<i32>} : memref<16x32xf32, #tpu.memory_space<vmem>>, vector<16x32xf32>,
    %c0_i32_17 = arith.constant 0 : i32
    %28 = arith.cmpi eq, %arg1, %c0_i32_17 : i32
    %29 = arith.extui %28 : i1 to i32
    %c0_i32_18 = arith.constant 0 : i32
    %30 = arith.cmpi ne, %29, %c0_i32_18 : i32
    scf.if %30 {
      %c0_19 = arith.constant 0 : index
      %c0_20 = arith.constant 0 : index
      %31 = vector.load %arg11[%c0_19, %c0_20] : memref<16x32xf32, #tpu.memory_space<vmem>>, vector<16x32xf32>
      %c0_21 = arith.constant 0 : index
      %c0_22 = arith.constant 0 : index
      %32 = vector.load %arg9[%c0_21, %c0_22] : memref<16x32xf32, #tpu.memory_space<vmem>>, vector<16x32xf32>
      tpu.vector_store %arg9[%c0_21, %c0_22], %31 {strides = array<i32>} : memref<16x32xf32, #tpu.memory_space<vmem>>, vector<16x32xf32>,
    } else {
    }
    return
  }
  func.func @transform_0(%arg0: i32, %arg1: i32) -> (i32, i32) {
    %c0_i32 = arith.constant 0 : i32
    %c0_i32_0 = arith.constant 0 : i32
    return %arg0, %c0_i32 : i32, i32
  }
  func.func @transform_1(%arg0: i32, %arg1: i32) -> (i32, i32) {
    %c0_i32 = arith.constant 0 : i32
    %c0_i32_0 = arith.constant 0 : i32
    %c0_i32_1 = arith.constant 0 : i32
    return %c0_i32, %c0_i32_0 : i32, i32
  }
  func.func @transform_2(%arg0: i32, %arg1: i32) -> (i32, i32) {
    %c0_i32 = arith.constant 0 : i32
    %c0_i32_0 = arith.constant 0 : i32
    %c0_i32_1 = arith.constant 0 : i32
    return %c0_i32, %c0_i32_0 : i32, i32
  }
  func.func @transform_3(%arg0: i32, %arg1: i32) -> (i32, i32) {
    %c0_i32 = arith.constant 0 : i32
    %c0_i32_0 = arith.constant 0 : i32
    return %c0_i32, %arg1 : i32, i32
  }
  func.func @transform_4(%arg0: i32, %arg1: i32) -> (i32, i32) {
    %c0_i32 = arith.constant 0 : i32
    %c0_i32_0 = arith.constant 0 : i32
    return %c0_i32, %arg1 : i32, i32
  }
  func.func @transform_5(%arg0: i32, %arg1: i32) -> (i32, i32) {
    %c0_i32 = arith.constant 0 : i32
    %c0_i32_0 = arith.constant 0 : i32
    return %arg1, %c0_i32 : i32, i32
  }
  func.func @transform_6(%arg0: i32, %arg1: i32) -> (i32, i32) {
    %c0_i32 = arith.constant 0 : i32
    %c0_i32_0 = arith.constant 0 : i32
    %c0_i32_1 = arith.constant 0 : i32
    return %c0_i32, %c0_i32_0 : i32, i32
  }
  func.func @transform_7(%arg0: i32, %arg1: i32) -> (i32, i32) {
    %c0_i32 = arith.constant 0 : i32
    %c0_i32_0 = arith.constant 0 : i32
    return %arg0, %c0_i32 : i32, i32
  }
}

module attributes {stable_mosaic.version = 11 : i64} {
  func.func @flash_attn_kernel(%arg0: i32, %arg1: i32, %arg2: i32, %arg3: memref<1x8x32xf32, #tpu.memory_space<vmem>>, %arg4: memref<1x8x32xbf16, #tpu.memory_space<vmem>>, %arg5: memref<1x8x32xbf16, #tpu.memory_space<vmem>>, %arg6: memref<1x8x32xbf16, #tpu.memory_space<vmem>>, %arg7: memref<32x32xbf16, #tpu.memory_space<vmem>>, %arg8: memref<1x32xf32, #tpu.memory_space<vmem>>, %arg9: memref<1x8x32xf32, #tpu.memory_space<vmem>>, %arg10: memref<8x4xf32, #tpu.memory_space<vmem>>, %arg11: memref<8x4xf32, #tpu.memory_space<vmem>>, %arg12: memref<8x32xf32, #tpu.memory_space<vmem>>, %arg13: memref<8x32xbf16, #tpu.memory_space<vmem>>) attributes {dimension_semantics = [#tpu.dimension_semantics<parallel>, #tpu.dimension_semantics<parallel>, #tpu.dimension_semantics<arbitrary>], iteration_bounds = array<i64: 2, 1, 1>, scalar_prefetch = 0 : i64, scratch_operands = 4 : i64, tpu.core_type = #tpu.core_type<tc>, window_params = [{transform_indices = @transform_0, window_bounds = array<i64: 1, 8, 32>}, {transform_indices = @transform_1, window_bounds = array<i64: 1, 8, 32>}, {transform_indices = @transform_2, window_bounds = array<i64: 1, 8, 32>}, {transform_indices = @transform_3, window_bounds = array<i64: 1, 8, 32>}, {pipeline_mode = #tpu.pipeline_mode<synchronous>, transform_indices = @transform_4, window_bounds = array<i64: 32, 32>}, {pipeline_mode = #tpu.pipeline_mode<synchronous>, transform_indices = @transform_5, window_bounds = array<i64: 1, 32>}, {transform_indices = @transform_6, window_bounds = array<i64: 1, 8, 32>}]} {
    %c0_i32 = arith.constant 0 : i32
    %0 = arith.cmpi eq, %arg2, %c0_i32 : i32
    %1 = arith.extui %0 : i1 to i32
    %c0_i32_0 = arith.constant 0 : i32
    %2 = arith.cmpi ne, %1, %c0_i32_0 : i32
    scf.if %2 {
      %cst = arith.constant -1.000000e+30 : f32
      %13 = vector.broadcast %cst : f32 to vector<8x4xf32>
      %c0 = arith.constant 0 : index
      %c0_6 = arith.constant 0 : index
      %14 = vector.load %arg10[%c0, %c0_6] : memref<8x4xf32, #tpu.memory_space<vmem>>, vector<8x4xf32>
      tpu.vector_store %arg10[%c0, %c0_6], %13 {strides = array<i32>} : memref<8x4xf32, #tpu.memory_space<vmem>>, vector<8x4xf32>,
      %cst_7 = arith.constant 0.000000e+00 : f32
      %15 = vector.broadcast %cst_7 : f32 to vector<8x4xf32>
      %c0_8 = arith.constant 0 : index
      %c0_9 = arith.constant 0 : index
      %16 = vector.load %arg11[%c0_8, %c0_9] : memref<8x4xf32, #tpu.memory_space<vmem>>, vector<8x4xf32>
      tpu.vector_store %arg11[%c0_8, %c0_9], %15 {strides = array<i32>} : memref<8x4xf32, #tpu.memory_space<vmem>>, vector<8x4xf32>,
      %cst_10 = arith.constant 0.000000e+00 : f32
      %17 = vector.broadcast %cst_10 : f32 to vector<8x32xf32>
      %c0_11 = arith.constant 0 : index
      %c0_12 = arith.constant 0 : index
      %18 = vector.load %arg12[%c0_11, %c0_12] : memref<8x32xf32, #tpu.memory_space<vmem>>, vector<8x32xf32>
      tpu.vector_store %arg12[%c0_11, %c0_12], %17 {strides = array<i32>} : memref<8x32xf32, #tpu.memory_space<vmem>>, vector<8x32xf32>,
    } else {
    }
    %c8_i32 = arith.constant 8 : i32
    %3 = arith.muli %arg1, %c8_i32 : i32
    %c8_i32_1 = arith.constant 8 : i32
    %4 = arith.muli %arg2, %c8_i32_1 : i32
    %c8_i32_2 = arith.constant 8 : i32
    %5 = arith.addi %3, %c8_i32_2 : i32
    %c1_i32 = arith.constant 1 : i32
    %6 = arith.subi %5, %c1_i32 : i32
    %7 = arith.cmpi sle, %4, %6 : i32
    %8 = arith.extui %7 : i1 to i32
    %c0_i32_3 = arith.constant 0 : i32
    %9 = arith.cmpi ne, %8, %c0_i32_3 : i32
    scf.if %9 {
      %c0 = arith.constant 0 : index
      %c0_6 = arith.constant 0 : index
      %c0_7 = arith.constant 0 : index
      %13 = vector.load %arg4[%c0, %c0_6, %c0_7] : memref<1x8x32xbf16, #tpu.memory_space<vmem>>, vector<1x8x32xbf16>
      %14 = vector.shape_cast %13 : vector<1x8x32xbf16> to vector<8x32xbf16>
      %c0_8 = arith.constant 0 : index
      %c0_9 = arith.constant 0 : index
      %c0_10 = arith.constant 0 : index
      %15 = vector.load %arg5[%c0_8, %c0_9, %c0_10] : memref<1x8x32xbf16, #tpu.memory_space<vmem>>, vector<1x8x32xbf16>
      %16 = vector.shape_cast %15 : vector<1x8x32xbf16> to vector<8x32xbf16>
      %c0_11 = arith.constant 0 : index
      %c0_12 = arith.constant 0 : index
      %c0_13 = arith.constant 0 : index
      %17 = vector.load %arg6[%c0_11, %c0_12, %c0_13] : memref<1x8x32xbf16, #tpu.memory_space<vmem>>, vector<1x8x32xbf16>
      %18 = vector.shape_cast %17 : vector<1x8x32xbf16> to vector<8x32xbf16>
      %19 = tpu.iota {dimensions = array<i32: 0>} : vector<8x8xi32>
      %20 = vector.broadcast %3 : i32 to vector<8x8xi32>
      %21 = arith.addi %20, %19 : vector<8x8xi32>
      %22 = tpu.iota {dimensions = array<i32: 1>} : vector<8x8xi32>
      %23 = vector.broadcast %4 : i32 to vector<8x8xi32>
      %24 = arith.addi %23, %22 : vector<8x8xi32>
      %25 = arith.cmpi sge, %21, %24 : vector<8x8xi32>
      %26 = vector.extract_strided_slice %14 {offsets = [0, 0], sizes = [8, 8], strides = [1, 1]} : vector<8x32xbf16> to vector<8x8xbf16>
      %27 = vector.extract_strided_slice %16 {offsets = [0, 0], sizes = [8, 8], strides = [1, 1]} : vector<8x32xbf16> to vector<8x8xbf16>
      %cst = arith.constant dense<0.000000e+00> : vector<8x8xf32>
      %28 = tpu.matmul %26, %27, %cst {dimension_numbers = #tpu.dot_dimension_numbers<[1], [1], [0], [0], [0, 0, 1, 0], [], []>} : vector<8x8xbf16>, vector<8x8xbf16>, vector<8x8xf32> -> vector<8x8xf32>
      %cst_14 = arith.constant 0.353553385 : f32
      %29 = vector.broadcast %cst_14 : f32 to vector<8x8xf32>
      %30 = arith.mulf %28, %29 : vector<8x8xf32>
      %cst_15 = arith.constant -1.000000e+06 : f32
      %31 = vector.broadcast %cst_15 : f32 to vector<8x8xf32>
      %32 = arith.select %25, %30, %31 : vector<8x8xi1>, vector<8x8xf32>
      %c0_16 = arith.constant 0 : index
      %c0_17 = arith.constant 0 : index
      %33 = vector.load %arg10[%c0_16, %c0_17] : memref<8x4xf32, #tpu.memory_space<vmem>>, vector<8x1xf32>
      %c0_18 = arith.constant 0 : index
      %c0_19 = arith.constant 0 : index
      %34 = vector.load %arg11[%c0_18, %c0_19] : memref<8x4xf32, #tpu.memory_space<vmem>>, vector<8x1xf32>
      %cst_20 = arith.constant dense<0xFF800000> : vector<8xf32>
      %35 = vector.multi_reduction <maximumf>, %32, %cst_20 [1] : vector<8x8xf32> to vector<8xf32>
      %36 = vector.shape_cast %35 : vector<8xf32> to vector<8x1xf32>
      %37 = arith.maximumf %33, %36 : vector<8x1xf32>
      %38 = arith.subf %33, %37 : vector<8x1xf32>
      %39 = math.exp %38 : vector<8x1xf32>
      %40 = vector.broadcast %37 : vector<8x1xf32> to vector<8x8xf32>
      %41 = arith.subf %32, %40 : vector<8x8xf32>
      %42 = math.exp %41 : vector<8x8xf32>
      %43 = arith.mulf %39, %34 : vector<8x1xf32>
      %cst_21 = arith.constant dense<0.000000e+00> : vector<8xf32>
      %44 = vector.multi_reduction <add>, %42, %cst_21 [1] : vector<8x8xf32> to vector<8xf32>
      %45 = vector.shape_cast %44 : vector<8xf32> to vector<8x1xf32>
      %46 = arith.addf %43, %45 : vector<8x1xf32>
      %c0_22 = arith.constant 0 : index
      %c0_23 = arith.constant 0 : index
      %47 = vector.load %arg11[%c0_22, %c0_23] : memref<8x4xf32, #tpu.memory_space<vmem>>, vector<8x1xf32>
      tpu.vector_store %arg11[%c0_22, %c0_23], %46 {strides = array<i32>} : memref<8x4xf32, #tpu.memory_space<vmem>>, vector<8x1xf32>,
      %c0_24 = arith.constant 0 : index
      %c0_25 = arith.constant 0 : index
      %48 = vector.load %arg12[%c0_24, %c0_25] : memref<8x32xf32, #tpu.memory_space<vmem>>, vector<8x8xf32>
      %49 = vector.broadcast %39 : vector<8x1xf32> to vector<8x8xf32>
      %50 = arith.mulf %49, %48 : vector<8x8xf32>
      %51 = arith.truncf %42 : vector<8x8xf32> to vector<8x8xbf16>
      %52 = vector.extract_strided_slice %18 {offsets = [0, 0], sizes = [8, 8], strides = [1, 1]} : vector<8x32xbf16> to vector<8x8xbf16>
      %cst_26 = arith.constant dense<0.000000e+00> : vector<8x8xf32>
      %53 = tpu.matmul %51, %52, %cst_26 {dimension_numbers = #tpu.dot_dimension_numbers<[1], [0], [0], [1], [0, 0, 1, 1], [], []>} : vector<8x8xbf16>, vector<8x8xbf16>, vector<8x8xf32> -> vector<8x8xf32>
      %54 = arith.addf %50, %53 : vector<8x8xf32>
      %c0_27 = arith.constant 0 : index
      %c0_28 = arith.constant 0 : index
      %55 = vector.load %arg12[%c0_27, %c0_28] : memref<8x32xf32, #tpu.memory_space<vmem>>, vector<8x8xf32>
      tpu.vector_store %arg12[%c0_27, %c0_28], %54 {strides = array<i32>} : memref<8x32xf32, #tpu.memory_space<vmem>>, vector<8x8xf32>,
      %c0_29 = arith.constant 0 : index
      %c0_30 = arith.constant 0 : index
      %56 = vector.load %arg10[%c0_29, %c0_30] : memref<8x4xf32, #tpu.memory_space<vmem>>, vector<8x1xf32>
      tpu.vector_store %arg10[%c0_29, %c0_30], %37 {strides = array<i32>} : memref<8x4xf32, #tpu.memory_space<vmem>>, vector<8x1xf32>,
      %57 = vector.extract_strided_slice %14 {offsets = [0, 8], sizes = [8, 8], strides = [1, 1]} : vector<8x32xbf16> to vector<8x8xbf16>
      %58 = vector.extract_strided_slice %16 {offsets = [0, 8], sizes = [8, 8], strides = [1, 1]} : vector<8x32xbf16> to vector<8x8xbf16>
      %cst_31 = arith.constant dense<0.000000e+00> : vector<8x8xf32>
      %59 = tpu.matmul %57, %58, %cst_31 {dimension_numbers = #tpu.dot_dimension_numbers<[1], [1], [0], [0], [0, 0, 1, 0], [], []>} : vector<8x8xbf16>, vector<8x8xbf16>, vector<8x8xf32> -> vector<8x8xf32>
      %cst_32 = arith.constant 0.353553385 : f32
      %60 = vector.broadcast %cst_32 : f32 to vector<8x8xf32>
      %61 = arith.mulf %59, %60 : vector<8x8xf32>
      %cst_33 = arith.constant -1.000000e+06 : f32
      %62 = vector.broadcast %cst_33 : f32 to vector<8x8xf32>
      %63 = arith.select %25, %61, %62 : vector<8x8xi1>, vector<8x8xf32>
      %c0_34 = arith.constant 0 : index
      %c1 = arith.constant 1 : index
      %64 = vector.load %arg10[%c0_34, %c1] : memref<8x4xf32, #tpu.memory_space<vmem>>, vector<8x1xf32>
      %c0_35 = arith.constant 0 : index
      %c1_36 = arith.constant 1 : index
      %65 = vector.load %arg11[%c0_35, %c1_36] : memref<8x4xf32, #tpu.memory_space<vmem>>, vector<8x1xf32>
      %cst_37 = arith.constant dense<0xFF800000> : vector<8xf32>
      %66 = vector.multi_reduction <maximumf>, %63, %cst_37 [1] : vector<8x8xf32> to vector<8xf32>
      %67 = vector.shape_cast %66 : vector<8xf32> to vector<8x1xf32>
      %68 = arith.maximumf %64, %67 : vector<8x1xf32>
      %69 = arith.subf %64, %68 : vector<8x1xf32>
      %70 = math.exp %69 : vector<8x1xf32>
      %71 = vector.broadcast %68 : vector<8x1xf32> to vector<8x8xf32>
      %72 = arith.subf %63, %71 : vector<8x8xf32>
      %73 = math.exp %72 : vector<8x8xf32>
      %74 = arith.mulf %70, %65 : vector<8x1xf32>
      %cst_38 = arith.constant dense<0.000000e+00> : vector<8xf32>
      %75 = vector.multi_reduction <add>, %73, %cst_38 [1] : vector<8x8xf32> to vector<8xf32>
      %76 = vector.shape_cast %75 : vector<8xf32> to vector<8x1xf32>
      %77 = arith.addf %74, %76 : vector<8x1xf32>
      %c0_39 = arith.constant 0 : index
      %c1_40 = arith.constant 1 : index
      %78 = vector.load %arg11[%c0_39, %c1_40] : memref<8x4xf32, #tpu.memory_space<vmem>>, vector<8x1xf32>
      tpu.vector_store %arg11[%c0_39, %c1_40], %77 {strides = array<i32>} : memref<8x4xf32, #tpu.memory_space<vmem>>, vector<8x1xf32>,
      %c0_41 = arith.constant 0 : index
      %c8 = arith.constant 8 : index
      %79 = vector.load %arg12[%c0_41, %c8] : memref<8x32xf32, #tpu.memory_space<vmem>>, vector<8x8xf32>
      %80 = vector.broadcast %70 : vector<8x1xf32> to vector<8x8xf32>
      %81 = arith.mulf %80, %79 : vector<8x8xf32>
      %82 = arith.truncf %73 : vector<8x8xf32> to vector<8x8xbf16>
      %83 = vector.extract_strided_slice %18 {offsets = [0, 8], sizes = [8, 8], strides = [1, 1]} : vector<8x32xbf16> to vector<8x8xbf16>
      %cst_42 = arith.constant dense<0.000000e+00> : vector<8x8xf32>
      %84 = tpu.matmul %82, %83, %cst_42 {dimension_numbers = #tpu.dot_dimension_numbers<[1], [0], [0], [1], [0, 0, 1, 1], [], []>} : vector<8x8xbf16>, vector<8x8xbf16>, vector<8x8xf32> -> vector<8x8xf32>
      %85 = arith.addf %81, %84 : vector<8x8xf32>
      %c0_43 = arith.constant 0 : index
      %c8_44 = arith.constant 8 : index
      %86 = vector.load %arg12[%c0_43, %c8_44] : memref<8x32xf32, #tpu.memory_space<vmem>>, vector<8x8xf32>
      tpu.vector_store %arg12[%c0_43, %c8_44], %85 {strides = array<i32>} : memref<8x32xf32, #tpu.memory_space<vmem>>, vector<8x8xf32>,
      %c0_45 = arith.constant 0 : index
      %c1_46 = arith.constant 1 : index
      %87 = vector.load %arg10[%c0_45, %c1_46] : memref<8x4xf32, #tpu.memory_space<vmem>>, vector<8x1xf32>
      tpu.vector_store %arg10[%c0_45, %c1_46], %68 {strides = array<i32>} : memref<8x4xf32, #tpu.memory_space<vmem>>, vector<8x1xf32>,
      %88 = vector.extract_strided_slice %14 {offsets = [0, 16], sizes = [8, 8], strides = [1, 1]} : vector<8x32xbf16> to vector<8x8xbf16>
      %89 = vector.extract_strided_slice %16 {offsets = [0, 16], sizes = [8, 8], strides = [1, 1]} : vector<8x32xbf16> to vector<8x8xbf16>
      %cst_47 = arith.constant dense<0.000000e+00> : vector<8x8xf32>
      %90 = tpu.matmul %88, %89, %cst_47 {dimension_numbers = #tpu.dot_dimension_numbers<[1], [1], [0], [0], [0, 0, 1, 0], [], []>} : vector<8x8xbf16>, vector<8x8xbf16>, vector<8x8xf32> -> vector<8x8xf32>
      %cst_48 = arith.constant 0.353553385 : f32
      %91 = vector.broadcast %cst_48 : f32 to vector<8x8xf32>
      %92 = arith.mulf %90, %91 : vector<8x8xf32>
      %cst_49 = arith.constant -1.000000e+06 : f32
      %93 = vector.broadcast %cst_49 : f32 to vector<8x8xf32>
      %94 = arith.select %25, %92, %93 : vector<8x8xi1>, vector<8x8xf32>
      %c0_50 = arith.constant 0 : index
      %c2 = arith.constant 2 : index
      %95 = vector.load %arg10[%c0_50, %c2] : memref<8x4xf32, #tpu.memory_space<vmem>>, vector<8x1xf32>
      %c0_51 = arith.constant 0 : index
      %c2_52 = arith.constant 2 : index
      %96 = vector.load %arg11[%c0_51, %c2_52] : memref<8x4xf32, #tpu.memory_space<vmem>>, vector<8x1xf32>
      %cst_53 = arith.constant dense<0xFF800000> : vector<8xf32>
      %97 = vector.multi_reduction <maximumf>, %94, %cst_53 [1] : vector<8x8xf32> to vector<8xf32>
      %98 = vector.shape_cast %97 : vector<8xf32> to vector<8x1xf32>
      %99 = arith.maximumf %95, %98 : vector<8x1xf32>
      %100 = arith.subf %95, %99 : vector<8x1xf32>
      %101 = math.exp %100 : vector<8x1xf32>
      %102 = vector.broadcast %99 : vector<8x1xf32> to vector<8x8xf32>
      %103 = arith.subf %94, %102 : vector<8x8xf32>
      %104 = math.exp %103 : vector<8x8xf32>
      %105 = arith.mulf %101, %96 : vector<8x1xf32>
      %cst_54 = arith.constant dense<0.000000e+00> : vector<8xf32>
      %106 = vector.multi_reduction <add>, %104, %cst_54 [1] : vector<8x8xf32> to vector<8xf32>
      %107 = vector.shape_cast %106 : vector<8xf32> to vector<8x1xf32>
      %108 = arith.addf %105, %107 : vector<8x1xf32>
      %c0_55 = arith.constant 0 : index
      %c2_56 = arith.constant 2 : index
      %109 = vector.load %arg11[%c0_55, %c2_56] : memref<8x4xf32, #tpu.memory_space<vmem>>, vector<8x1xf32>
      tpu.vector_store %arg11[%c0_55, %c2_56], %108 {strides = array<i32>} : memref<8x4xf32, #tpu.memory_space<vmem>>, vector<8x1xf32>,
      %c0_57 = arith.constant 0 : index
      %c16 = arith.constant 16 : index
      %110 = vector.load %arg12[%c0_57, %c16] : memref<8x32xf32, #tpu.memory_space<vmem>>, vector<8x8xf32>
      %111 = vector.broadcast %101 : vector<8x1xf32> to vector<8x8xf32>
      %112 = arith.mulf %111, %110 : vector<8x8xf32>
      %113 = arith.truncf %104 : vector<8x8xf32> to vector<8x8xbf16>
      %114 = vector.extract_strided_slice %18 {offsets = [0, 16], sizes = [8, 8], strides = [1, 1]} : vector<8x32xbf16> to vector<8x8xbf16>
      %cst_58 = arith.constant dense<0.000000e+00> : vector<8x8xf32>
      %115 = tpu.matmul %113, %114, %cst_58 {dimension_numbers = #tpu.dot_dimension_numbers<[1], [0], [0], [1], [0, 0, 1, 1], [], []>} : vector<8x8xbf16>, vector<8x8xbf16>, vector<8x8xf32> -> vector<8x8xf32>
      %116 = arith.addf %112, %115 : vector<8x8xf32>
      %c0_59 = arith.constant 0 : index
      %c16_60 = arith.constant 16 : index
      %117 = vector.load %arg12[%c0_59, %c16_60] : memref<8x32xf32, #tpu.memory_space<vmem>>, vector<8x8xf32>
      tpu.vector_store %arg12[%c0_59, %c16_60], %116 {strides = array<i32>} : memref<8x32xf32, #tpu.memory_space<vmem>>, vector<8x8xf32>,
      %c0_61 = arith.constant 0 : index
      %c2_62 = arith.constant 2 : index
      %118 = vector.load %arg10[%c0_61, %c2_62] : memref<8x4xf32, #tpu.memory_space<vmem>>, vector<8x1xf32>
      tpu.vector_store %arg10[%c0_61, %c2_62], %99 {strides = array<i32>} : memref<8x4xf32, #tpu.memory_space<vmem>>, vector<8x1xf32>,
      %119 = vector.extract_strided_slice %14 {offsets = [0, 24], sizes = [8, 8], strides = [1, 1]} : vector<8x32xbf16> to vector<8x8xbf16>
      %120 = vector.extract_strided_slice %16 {offsets = [0, 24], sizes = [8, 8], strides = [1, 1]} : vector<8x32xbf16> to vector<8x8xbf16>
      %cst_63 = arith.constant dense<0.000000e+00> : vector<8x8xf32>
      %121 = tpu.matmul %119, %120, %cst_63 {dimension_numbers = #tpu.dot_dimension_numbers<[1], [1], [0], [0], [0, 0, 1, 0], [], []>} : vector<8x8xbf16>, vector<8x8xbf16>, vector<8x8xf32> -> vector<8x8xf32>
      %cst_64 = arith.constant 0.353553385 : f32
      %122 = vector.broadcast %cst_64 : f32 to vector<8x8xf32>
      %123 = arith.mulf %121, %122 : vector<8x8xf32>
      %cst_65 = arith.constant -1.000000e+06 : f32
      %124 = vector.broadcast %cst_65 : f32 to vector<8x8xf32>
      %125 = arith.select %25, %123, %124 : vector<8x8xi1>, vector<8x8xf32>
      %c0_66 = arith.constant 0 : index
      %c3 = arith.constant 3 : index
      %126 = vector.load %arg10[%c0_66, %c3] : memref<8x4xf32, #tpu.memory_space<vmem>>, vector<8x1xf32>
      %c0_67 = arith.constant 0 : index
      %c3_68 = arith.constant 3 : index
      %127 = vector.load %arg11[%c0_67, %c3_68] : memref<8x4xf32, #tpu.memory_space<vmem>>, vector<8x1xf32>
      %cst_69 = arith.constant dense<0xFF800000> : vector<8xf32>
      %128 = vector.multi_reduction <maximumf>, %125, %cst_69 [1] : vector<8x8xf32> to vector<8xf32>
      %129 = vector.shape_cast %128 : vector<8xf32> to vector<8x1xf32>
      %130 = arith.maximumf %126, %129 : vector<8x1xf32>
      %131 = arith.subf %126, %130 : vector<8x1xf32>
      %132 = math.exp %131 : vector<8x1xf32>
      %133 = vector.broadcast %130 : vector<8x1xf32> to vector<8x8xf32>
      %134 = arith.subf %125, %133 : vector<8x8xf32>
      %135 = math.exp %134 : vector<8x8xf32>
      %136 = arith.mulf %132, %127 : vector<8x1xf32>
      %cst_70 = arith.constant dense<0.000000e+00> : vector<8xf32>
      %137 = vector.multi_reduction <add>, %135, %cst_70 [1] : vector<8x8xf32> to vector<8xf32>
      %138 = vector.shape_cast %137 : vector<8xf32> to vector<8x1xf32>
      %139 = arith.addf %136, %138 : vector<8x1xf32>
      %c0_71 = arith.constant 0 : index
      %c3_72 = arith.constant 3 : index
      %140 = vector.load %arg11[%c0_71, %c3_72] : memref<8x4xf32, #tpu.memory_space<vmem>>, vector<8x1xf32>
      tpu.vector_store %arg11[%c0_71, %c3_72], %139 {strides = array<i32>} : memref<8x4xf32, #tpu.memory_space<vmem>>, vector<8x1xf32>,
      %c0_73 = arith.constant 0 : index
      %c24 = arith.constant 24 : index
      %141 = vector.load %arg12[%c0_73, %c24] : memref<8x32xf32, #tpu.memory_space<vmem>>, vector<8x8xf32>
      %142 = vector.broadcast %132 : vector<8x1xf32> to vector<8x8xf32>
      %143 = arith.mulf %142, %141 : vector<8x8xf32>
      %144 = arith.truncf %135 : vector<8x8xf32> to vector<8x8xbf16>
      %145 = vector.extract_strided_slice %18 {offsets = [0, 24], sizes = [8, 8], strides = [1, 1]} : vector<8x32xbf16> to vector<8x8xbf16>
      %cst_74 = arith.constant dense<0.000000e+00> : vector<8x8xf32>
      %146 = tpu.matmul %144, %145, %cst_74 {dimension_numbers = #tpu.dot_dimension_numbers<[1], [0], [0], [1], [0, 0, 1, 1], [], []>} : vector<8x8xbf16>, vector<8x8xbf16>, vector<8x8xf32> -> vector<8x8xf32>
      %147 = arith.addf %143, %146 : vector<8x8xf32>
      %c0_75 = arith.constant 0 : index
      %c24_76 = arith.constant 24 : index
      %148 = vector.load %arg12[%c0_75, %c24_76] : memref<8x32xf32, #tpu.memory_space<vmem>>, vector<8x8xf32>
      tpu.vector_store %arg12[%c0_75, %c24_76], %147 {strides = array<i32>} : memref<8x32xf32, #tpu.memory_space<vmem>>, vector<8x8xf32>,
      %c0_77 = arith.constant 0 : index
      %c3_78 = arith.constant 3 : index
      %149 = vector.load %arg10[%c0_77, %c3_78] : memref<8x4xf32, #tpu.memory_space<vmem>>, vector<8x1xf32>
      tpu.vector_store %arg10[%c0_77, %c3_78], %130 {strides = array<i32>} : memref<8x4xf32, #tpu.memory_space<vmem>>, vector<8x1xf32>,
    } else {
    }
    %c0_i32_4 = arith.constant 0 : i32
    %10 = arith.cmpi eq, %arg2, %c0_i32_4 : i32
    %11 = arith.extui %10 : i1 to i32
    %c0_i32_5 = arith.constant 0 : i32
    %12 = arith.cmpi ne, %11, %c0_i32_5 : i32
    scf.if %12 {
      %c0 = arith.constant 0 : index
      %c0_6 = arith.constant 0 : index
      %13 = vector.load %arg11[%c0, %c0_6] : memref<8x4xf32, #tpu.memory_space<vmem>>, vector<8x1xf32>
      %14 = tpu.reciprocal %13 {approx = true} : vector<8x1xf32> -> vector<8x1xf32>
      %c0_7 = arith.constant 0 : index
      %c0_8 = arith.constant 0 : index
      %15 = vector.load %arg12[%c0_7, %c0_8] : memref<8x32xf32, #tpu.memory_space<vmem>>, vector<8x8xf32>
      %16 = vector.broadcast %14 : vector<8x1xf32> to vector<8x8xf32>
      %17 = arith.mulf %15, %16 : vector<8x8xf32>
      %18 = arith.truncf %17 : vector<8x8xf32> to vector<8x8xbf16>
      %c0_9 = arith.constant 0 : index
      %c0_10 = arith.constant 0 : index
      %19 = vector.load %arg13[%c0_9, %c0_10] : memref<8x32xbf16, #tpu.memory_space<vmem>>, vector<8x8xbf16>
      tpu.vector_store %arg13[%c0_9, %c0_10], %18 {strides = array<i32>} : memref<8x32xbf16, #tpu.memory_space<vmem>>, vector<8x8xbf16>,
      %c0_11 = arith.constant 0 : index
      %c1 = arith.constant 1 : index
      %20 = vector.load %arg11[%c0_11, %c1] : memref<8x4xf32, #tpu.memory_space<vmem>>, vector<8x1xf32>
      %21 = tpu.reciprocal %20 {approx = true} : vector<8x1xf32> -> vector<8x1xf32>
      %c0_12 = arith.constant 0 : index
      %c8 = arith.constant 8 : index
      %22 = vector.load %arg12[%c0_12, %c8] : memref<8x32xf32, #tpu.memory_space<vmem>>, vector<8x8xf32>
      %23 = vector.broadcast %21 : vector<8x1xf32> to vector<8x8xf32>
      %24 = arith.mulf %22, %23 : vector<8x8xf32>
      %25 = arith.truncf %24 : vector<8x8xf32> to vector<8x8xbf16>
      %c0_13 = arith.constant 0 : index
      %c8_14 = arith.constant 8 : index
      %26 = vector.load %arg13[%c0_13, %c8_14] : memref<8x32xbf16, #tpu.memory_space<vmem>>, vector<8x8xbf16>
      tpu.vector_store %arg13[%c0_13, %c8_14], %25 {strides = array<i32>} : memref<8x32xbf16, #tpu.memory_space<vmem>>, vector<8x8xbf16>,
      %c0_15 = arith.constant 0 : index
      %c2 = arith.constant 2 : index
      %27 = vector.load %arg11[%c0_15, %c2] : memref<8x4xf32, #tpu.memory_space<vmem>>, vector<8x1xf32>
      %28 = tpu.reciprocal %27 {approx = true} : vector<8x1xf32> -> vector<8x1xf32>
      %c0_16 = arith.constant 0 : index
      %c16 = arith.constant 16 : index
      %29 = vector.load %arg12[%c0_16, %c16] : memref<8x32xf32, #tpu.memory_space<vmem>>, vector<8x8xf32>
      %30 = vector.broadcast %28 : vector<8x1xf32> to vector<8x8xf32>
      %31 = arith.mulf %29, %30 : vector<8x8xf32>
      %32 = arith.truncf %31 : vector<8x8xf32> to vector<8x8xbf16>
      %c0_17 = arith.constant 0 : index
      %c16_18 = arith.constant 16 : index
      %33 = vector.load %arg13[%c0_17, %c16_18] : memref<8x32xbf16, #tpu.memory_space<vmem>>, vector<8x8xbf16>
      tpu.vector_store %arg13[%c0_17, %c16_18], %32 {strides = array<i32>} : memref<8x32xbf16, #tpu.memory_space<vmem>>, vector<8x8xbf16>,
      %c0_19 = arith.constant 0 : index
      %c3 = arith.constant 3 : index
      %34 = vector.load %arg11[%c0_19, %c3] : memref<8x4xf32, #tpu.memory_space<vmem>>, vector<8x1xf32>
      %35 = tpu.reciprocal %34 {approx = true} : vector<8x1xf32> -> vector<8x1xf32>
      %c0_20 = arith.constant 0 : index
      %c24 = arith.constant 24 : index
      %36 = vector.load %arg12[%c0_20, %c24] : memref<8x32xf32, #tpu.memory_space<vmem>>, vector<8x8xf32>
      %37 = vector.broadcast %35 : vector<8x1xf32> to vector<8x8xf32>
      %38 = arith.mulf %36, %37 : vector<8x8xf32>
      %39 = arith.truncf %38 : vector<8x8xf32> to vector<8x8xbf16>
      %c0_21 = arith.constant 0 : index
      %c24_22 = arith.constant 24 : index
      %40 = vector.load %arg13[%c0_21, %c24_22] : memref<8x32xbf16, #tpu.memory_space<vmem>>, vector<8x8xbf16>
      tpu.vector_store %arg13[%c0_21, %c24_22], %39 {strides = array<i32>} : memref<8x32xbf16, #tpu.memory_space<vmem>>, vector<8x8xbf16>,
      %c0_23 = arith.constant 0 : index
      %c0_24 = arith.constant 0 : index
      %41 = vector.load %arg13[%c0_23, %c0_24] : memref<8x32xbf16, #tpu.memory_space<vmem>>, vector<8x32xbf16>
      %c0_25 = arith.constant 0 : index
      %c0_26 = arith.constant 0 : index
      %42 = vector.load %arg7[%c0_25, %c0_26] : memref<32x32xbf16, #tpu.memory_space<vmem>>, vector<32x32xbf16>
      %cst = arith.constant dense<0.000000e+00> : vector<8x32xf32>
      %43 = tpu.matmul %41, %42, %cst {dimension_numbers = #tpu.dot_dimension_numbers<[1], [0], [0], [1], [0, 0, 1, 1], [], []>} : vector<8x32xbf16>, vector<32x32xbf16>, vector<8x32xf32> -> vector<8x32xf32>
      %c0_27 = arith.constant 0 : index
      %c0_28 = arith.constant 0 : index
      %44 = vector.load %arg8[%c0_27, %c0_28] : memref<1x32xf32, #tpu.memory_space<vmem>>, vector<1x32xf32>
      %45 = vector.broadcast %44 : vector<1x32xf32> to vector<8x32xf32>
      %46 = arith.addf %43, %45 : vector<8x32xf32>
      %c0_29 = arith.constant 0 : index
      %c0_30 = arith.constant 0 : index
      %c0_31 = arith.constant 0 : index
      %47 = vector.load %arg3[%c0_29, %c0_30, %c0_31] : memref<1x8x32xf32, #tpu.memory_space<vmem>>, vector<1x8x32xf32>
      %48 = vector.shape_cast %47 : vector<1x8x32xf32> to vector<8x32xf32>
      %49 = arith.addf %48, %46 : vector<8x32xf32>
      %c0_32 = arith.constant 0 : index
      %c0_33 = arith.constant 0 : index
      %c0_34 = arith.constant 0 : index
      %50 = vector.load %arg9[%c0_32, %c0_33, %c0_34] : memref<1x8x32xf32, #tpu.memory_space<vmem>>, vector<1x8x32xf32>
      %51 = vector.shape_cast %50 : vector<1x8x32xf32> to vector<8x32xf32>
      %52 = vector.shape_cast %49 : vector<8x32xf32> to vector<1x8x32xf32>
      tpu.vector_store %arg9[%c0_32, %c0_33, %c0_34], %52 {strides = array<i32>} : memref<1x8x32xf32, #tpu.memory_space<vmem>>, vector<1x8x32xf32>,
    } else {
    }
    return
  }
  func.func @transform_0(%arg0: i32, %arg1: i32, %arg2: i32) -> (i32, i32, i32) {
    %c0_i32 = arith.constant 0 : i32
    %c0_i32_0 = arith.constant 0 : i32
    return %arg0, %arg1, %c0_i32 : i32, i32, i32
  }
  func.func @transform_1(%arg0: i32, %arg1: i32, %arg2: i32) -> (i32, i32, i32) {
    %c0_i32 = arith.constant 0 : i32
    %c0_i32_0 = arith.constant 0 : i32
    return %arg0, %arg1, %c0_i32 : i32, i32, i32
  }
  func.func @transform_2(%arg0: i32, %arg1: i32, %arg2: i32) -> (i32, i32, i32) {
    %c0_i32 = arith.constant 0 : i32
    %c0_i32_0 = arith.constant 0 : i32
    return %arg0, %arg2, %c0_i32 : i32, i32, i32
  }
  func.func @transform_3(%arg0: i32, %arg1: i32, %arg2: i32) -> (i32, i32, i32) {
    %c0_i32 = arith.constant 0 : i32
    %c0_i32_0 = arith.constant 0 : i32
    return %arg0, %arg2, %c0_i32 : i32, i32, i32
  }
  func.func @transform_4(%arg0: i32, %arg1: i32, %arg2: i32) -> (i32, i32) {
    %c0_i32 = arith.constant 0 : i32
    %c0_i32_0 = arith.constant 0 : i32
    %c0_i32_1 = arith.constant 0 : i32
    return %c0_i32, %c0_i32_0 : i32, i32
  }
  func.func @transform_5(%arg0: i32, %arg1: i32, %arg2: i32) -> (i32, i32) {
    %c0_i32 = arith.constant 0 : i32
    %c0_i32_0 = arith.constant 0 : i32
    %c0_i32_1 = arith.constant 0 : i32
    return %c0_i32, %c0_i32_0 : i32, i32
  }
  func.func @transform_6(%arg0: i32, %arg1: i32, %arg2: i32) -> (i32, i32, i32) {
    %c0_i32 = arith.constant 0 : i32
    %c0_i32_0 = arith.constant 0 : i32
    return %arg0, %arg1, %c0_i32 : i32, i32, i32
  }
}

module attributes {stable_mosaic.version = 11 : i64} {
  func.func @qkv_kernel(%arg0: i32, %arg1: i32, %arg2: memref<1x8x32xf32, #tpu.memory_space<vmem>>, %arg3: memref<1x32xf32, #tpu.memory_space<vmem>>, %arg4: memref<1x32xf32, #tpu.memory_space<vmem>>, %arg5: memref<32x96xbf16, #tpu.memory_space<vmem>>, %arg6: memref<1x96xf32, #tpu.memory_space<vmem>>, %arg7: memref<1x8x32xbf16, #tpu.memory_space<vmem>>, %arg8: memref<1x8x32xbf16, #tpu.memory_space<vmem>>, %arg9: memref<1x8x32xbf16, #tpu.memory_space<vmem>>) attributes {dimension_semantics = [#tpu.dimension_semantics<parallel>, #tpu.dimension_semantics<parallel>], iteration_bounds = array<i64: 2, 1>, scalar_prefetch = 0 : i64, scratch_operands = 0 : i64, tpu.core_type = #tpu.core_type<tc>, window_params = [{transform_indices = @transform_0, window_bounds = array<i64: 1, 8, 32>}, {pipeline_mode = #tpu.pipeline_mode<synchronous>, transform_indices = @transform_1, window_bounds = array<i64: 1, 32>}, {pipeline_mode = #tpu.pipeline_mode<synchronous>, transform_indices = @transform_2, window_bounds = array<i64: 1, 32>}, {pipeline_mode = #tpu.pipeline_mode<synchronous>, transform_indices = @transform_3, window_bounds = array<i64: 32, 96>}, {pipeline_mode = #tpu.pipeline_mode<synchronous>, transform_indices = @transform_4, window_bounds = array<i64: 1, 96>}, {transform_indices = @transform_5, window_bounds = array<i64: 1, 8, 32>}, {transform_indices = @transform_6, window_bounds = array<i64: 1, 8, 32>}, {transform_indices = @transform_7, window_bounds = array<i64: 1, 8, 32>}]} {
    %c0 = arith.constant 0 : index
    %c0_0 = arith.constant 0 : index
    %c0_1 = arith.constant 0 : index
    %0 = vector.load %arg2[%c0, %c0_0, %c0_1] : memref<1x8x32xf32, #tpu.memory_space<vmem>>, vector<1x8x32xf32>
    %1 = vector.shape_cast %0 : vector<1x8x32xf32> to vector<8x32xf32>
    %c0_2 = arith.constant 0 : index
    %c0_3 = arith.constant 0 : index
    %2 = vector.load %arg3[%c0_2, %c0_3] : memref<1x32xf32, #tpu.memory_space<vmem>>, vector<1x32xf32>
    %c0_4 = arith.constant 0 : index
    %c0_5 = arith.constant 0 : index
    %3 = vector.load %arg4[%c0_4, %c0_5] : memref<1x32xf32, #tpu.memory_space<vmem>>, vector<1x32xf32>
    %cst = arith.constant dense<0.000000e+00> : vector<8xf32>
    %4 = vector.multi_reduction <add>, %1, %cst [1] : vector<8x32xf32> to vector<8xf32>
    %5 = vector.shape_cast %4 : vector<8xf32> to vector<8x1xf32>
    %cst_6 = arith.constant 3.200000e+01 : f32
    %6 = vector.broadcast %cst_6 : f32 to vector<8x1xf32>
    %7 = arith.divf %5, %6 : vector<8x1xf32>
    %8 = vector.broadcast %7 : vector<8x1xf32> to vector<8x32xf32>
    %9 = arith.subf %1, %8 : vector<8x32xf32>
    %10 = arith.mulf %9, %9 : vector<8x32xf32>
    %cst_7 = arith.constant dense<0.000000e+00> : vector<8xf32>
    %11 = vector.multi_reduction <add>, %10, %cst_7 [1] : vector<8x32xf32> to vector<8xf32>
    %12 = vector.shape_cast %11 : vector<8xf32> to vector<8x1xf32>
    %cst_8 = arith.constant 3.200000e+01 : f32
    %13 = vector.broadcast %cst_8 : f32 to vector<8x1xf32>
    %14 = arith.divf %12, %13 : vector<8x1xf32>
    %15 = vector.broadcast %7 : vector<8x1xf32> to vector<8x32xf32>
    %16 = arith.subf %1, %15 : vector<8x32xf32>
    %cst_9 = arith.constant 9.99999974E-6 : f32
    %17 = vector.broadcast %cst_9 : f32 to vector<8x1xf32>
    %18 = arith.addf %14, %17 : vector<8x1xf32>
    %19 = math.rsqrt %18 : vector<8x1xf32>
    %20 = vector.broadcast %19 : vector<8x1xf32> to vector<8x32xf32>
    %21 = arith.mulf %16, %20 : vector<8x32xf32>
    %22 = vector.broadcast %2 : vector<1x32xf32> to vector<8x32xf32>
    %23 = arith.mulf %21, %22 : vector<8x32xf32>
    %24 = vector.broadcast %3 : vector<1x32xf32> to vector<8x32xf32>
    %25 = arith.addf %23, %24 : vector<8x32xf32>
    %26 = arith.truncf %25 : vector<8x32xf32> to vector<8x32xbf16>
    %c0_10 = arith.constant 0 : index
    %c0_11 = arith.constant 0 : index
    %27 = vector.load %arg5[%c0_10, %c0_11] : memref<32x96xbf16, #tpu.memory_space<vmem>>, vector<32x96xbf16>
    %cst_12 = arith.constant dense<0.000000e+00> : vector<8x96xf32>
    %28 = tpu.matmul %26, %27, %cst_12 {dimension_numbers = #tpu.dot_dimension_numbers<[1], [0], [0], [1], [0, 0, 1, 1], [], []>} : vector<8x32xbf16>, vector<32x96xbf16>, vector<8x96xf32> -> vector<8x96xf32>
    %c0_13 = arith.constant 0 : index
    %c0_14 = arith.constant 0 : index
    %29 = vector.load %arg6[%c0_13, %c0_14] : memref<1x96xf32, #tpu.memory_space<vmem>>, vector<1x96xf32>
    %30 = vector.broadcast %29 : vector<1x96xf32> to vector<8x96xf32>
    %31 = arith.addf %28, %30 : vector<8x96xf32>
    %32 = vector.extract_strided_slice %31 {offsets = [0, 0], sizes = [8, 32], strides = [1, 1]} : vector<8x96xf32> to vector<8x32xf32>
    %33 = arith.truncf %32 : vector<8x32xf32> to vector<8x32xbf16>
    %c0_15 = arith.constant 0 : index
    %c0_16 = arith.constant 0 : index
    %c0_17 = arith.constant 0 : index
    %34 = vector.load %arg7[%c0_15, %c0_16, %c0_17] : memref<1x8x32xbf16, #tpu.memory_space<vmem>>, vector<1x8x32xbf16>
    %35 = vector.shape_cast %34 : vector<1x8x32xbf16> to vector<8x32xbf16>
    %36 = vector.shape_cast %33 : vector<8x32xbf16> to vector<1x8x32xbf16>
    tpu.vector_store %arg7[%c0_15, %c0_16, %c0_17], %36 {strides = array<i32>} : memref<1x8x32xbf16, #tpu.memory_space<vmem>>, vector<1x8x32xbf16>,
    %37 = vector.extract_strided_slice %31 {offsets = [0, 32], sizes = [8, 32], strides = [1, 1]} : vector<8x96xf32> to vector<8x32xf32>
    %38 = arith.truncf %37 : vector<8x32xf32> to vector<8x32xbf16>
    %c0_18 = arith.constant 0 : index
    %c0_19 = arith.constant 0 : index
    %c0_20 = arith.constant 0 : index
    %39 = vector.load %arg8[%c0_18, %c0_19, %c0_20] : memref<1x8x32xbf16, #tpu.memory_space<vmem>>, vector<1x8x32xbf16>
    %40 = vector.shape_cast %39 : vector<1x8x32xbf16> to vector<8x32xbf16>
    %41 = vector.shape_cast %38 : vector<8x32xbf16> to vector<1x8x32xbf16>
    tpu.vector_store %arg8[%c0_18, %c0_19, %c0_20], %41 {strides = array<i32>} : memref<1x8x32xbf16, #tpu.memory_space<vmem>>, vector<1x8x32xbf16>,
    %42 = vector.extract_strided_slice %31 {offsets = [0, 64], sizes = [8, 32], strides = [1, 1]} : vector<8x96xf32> to vector<8x32xf32>
    %43 = arith.truncf %42 : vector<8x32xf32> to vector<8x32xbf16>
    %c0_21 = arith.constant 0 : index
    %c0_22 = arith.constant 0 : index
    %c0_23 = arith.constant 0 : index
    %44 = vector.load %arg9[%c0_21, %c0_22, %c0_23] : memref<1x8x32xbf16, #tpu.memory_space<vmem>>, vector<1x8x32xbf16>
    %45 = vector.shape_cast %44 : vector<1x8x32xbf16> to vector<8x32xbf16>
    %46 = vector.shape_cast %43 : vector<8x32xbf16> to vector<1x8x32xbf16>
    tpu.vector_store %arg9[%c0_21, %c0_22, %c0_23], %46 {strides = array<i32>} : memref<1x8x32xbf16, #tpu.memory_space<vmem>>, vector<1x8x32xbf16>,
    return
  }
  func.func @transform_0(%arg0: i32, %arg1: i32) -> (i32, i32, i32) {
    %c0_i32 = arith.constant 0 : i32
    %c0_i32_0 = arith.constant 0 : i32
    return %arg0, %arg1, %c0_i32 : i32, i32, i32
  }
  func.func @transform_1(%arg0: i32, %arg1: i32) -> (i32, i32) {
    %c0_i32 = arith.constant 0 : i32
    %c0_i32_0 = arith.constant 0 : i32
    %c0_i32_1 = arith.constant 0 : i32
    return %c0_i32, %c0_i32_0 : i32, i32
  }
  func.func @transform_2(%arg0: i32, %arg1: i32) -> (i32, i32) {
    %c0_i32 = arith.constant 0 : i32
    %c0_i32_0 = arith.constant 0 : i32
    %c0_i32_1 = arith.constant 0 : i32
    return %c0_i32, %c0_i32_0 : i32, i32
  }
  func.func @transform_3(%arg0: i32, %arg1: i32) -> (i32, i32) {
    %c0_i32 = arith.constant 0 : i32
    %c0_i32_0 = arith.constant 0 : i32
    %c0_i32_1 = arith.constant 0 : i32
    return %c0_i32, %c0_i32_0 : i32, i32
  }
  func.func @transform_4(%arg0: i32, %arg1: i32) -> (i32, i32) {
    %c0_i32 = arith.constant 0 : i32
    %c0_i32_0 = arith.constant 0 : i32
    %c0_i32_1 = arith.constant 0 : i32
    return %c0_i32, %c0_i32_0 : i32, i32
  }
  func.func @transform_5(%arg0: i32, %arg1: i32) -> (i32, i32, i32) {
    %c0_i32 = arith.constant 0 : i32
    %c0_i32_0 = arith.constant 0 : i32
    return %arg0, %arg1, %c0_i32 : i32, i32, i32
  }
  func.func @transform_6(%arg0: i32, %arg1: i32) -> (i32, i32, i32) {
    %c0_i32 = arith.constant 0 : i32
    %c0_i32_0 = arith.constant 0 : i32
    return %arg0, %arg1, %c0_i32 : i32, i32, i32
  }
  func.func @transform_7(%arg0: i32, %arg1: i32) -> (i32, i32, i32) {
    %c0_i32 = arith.constant 0 : i32
    %c0_i32_0 = arith.constant 0 : i32
    return %arg0, %arg1, %c0_i32 : i32, i32, i32
  }
}

module attributes {stable_mosaic.version = 11 : i64} {
  func.func @final_kernel(%arg0: i32, %arg1: i32, %arg2: memref<16x32xf32, #tpu.memory_space<vmem>>, %arg3: memref<1x32xf32, #tpu.memory_space<vmem>>, %arg4: memref<1x32xf32, #tpu.memory_space<vmem>>, %arg5: memref<32x64xbf16, #tpu.memory_space<vmem>>, %arg6: memref<16x64xbf16, #tpu.memory_space<vmem>>, %arg7: memref<16x32xbf16, #tpu.memory_space<vmem>>) attributes {dimension_semantics = [#tpu.dimension_semantics<parallel>, #tpu.dimension_semantics<arbitrary>], iteration_bounds = array<i64: 1, 1>, scalar_prefetch = 0 : i64, scratch_operands = 1 : i64, tpu.core_type = #tpu.core_type<tc>, window_params = [{transform_indices = @transform_0, window_bounds = array<i64: 16, 32>}, {pipeline_mode = #tpu.pipeline_mode<synchronous>, transform_indices = @transform_1, window_bounds = array<i64: 1, 32>}, {pipeline_mode = #tpu.pipeline_mode<synchronous>, transform_indices = @transform_2, window_bounds = array<i64: 1, 32>}, {transform_indices = @transform_3, window_bounds = array<i64: 32, 64>}, {transform_indices = @transform_4, window_bounds = array<i64: 16, 64>}]} {
    %c0_i32 = arith.constant 0 : i32
    %0 = arith.cmpi eq, %arg1, %c0_i32 : i32
    %1 = arith.extui %0 : i1 to i32
    %c0_i32_0 = arith.constant 0 : i32
    %2 = arith.cmpi ne, %1, %c0_i32_0 : i32
    scf.if %2 {
      %c0_6 = arith.constant 0 : index
      %c0_7 = arith.constant 0 : index
      %8 = vector.load %arg2[%c0_6, %c0_7] : memref<16x32xf32, #tpu.memory_space<vmem>>, vector<16x32xf32>
      %c0_8 = arith.constant 0 : index
      %c0_9 = arith.constant 0 : index
      %9 = vector.load %arg3[%c0_8, %c0_9] : memref<1x32xf32, #tpu.memory_space<vmem>>, vector<1x32xf32>
      %c0_10 = arith.constant 0 : index
      %c0_11 = arith.constant 0 : index
      %10 = vector.load %arg4[%c0_10, %c0_11] : memref<1x32xf32, #tpu.memory_space<vmem>>, vector<1x32xf32>
      %cst_12 = arith.constant dense<0.000000e+00> : vector<16xf32>
      %11 = vector.multi_reduction <add>, %8, %cst_12 [1] : vector<16x32xf32> to vector<16xf32>
      %12 = vector.shape_cast %11 : vector<16xf32> to vector<16x1xf32>
      %cst_13 = arith.constant 3.200000e+01 : f32
      %13 = vector.broadcast %cst_13 : f32 to vector<16x1xf32>
      %14 = arith.divf %12, %13 : vector<16x1xf32>
      %15 = vector.broadcast %14 : vector<16x1xf32> to vector<16x32xf32>
      %16 = arith.subf %8, %15 : vector<16x32xf32>
      %17 = arith.mulf %16, %16 : vector<16x32xf32>
      %cst_14 = arith.constant dense<0.000000e+00> : vector<16xf32>
      %18 = vector.multi_reduction <add>, %17, %cst_14 [1] : vector<16x32xf32> to vector<16xf32>
      %19 = vector.shape_cast %18 : vector<16xf32> to vector<16x1xf32>
      %cst_15 = arith.constant 3.200000e+01 : f32
      %20 = vector.broadcast %cst_15 : f32 to vector<16x1xf32>
      %21 = arith.divf %19, %20 : vector<16x1xf32>
      %22 = vector.broadcast %14 : vector<16x1xf32> to vector<16x32xf32>
      %23 = arith.subf %8, %22 : vector<16x32xf32>
      %cst_16 = arith.constant 9.99999974E-6 : f32
      %24 = vector.broadcast %cst_16 : f32 to vector<16x1xf32>
      %25 = arith.addf %21, %24 : vector<16x1xf32>
      %26 = math.rsqrt %25 : vector<16x1xf32>
      %27 = vector.broadcast %26 : vector<16x1xf32> to vector<16x32xf32>
      %28 = arith.mulf %23, %27 : vector<16x32xf32>
      %29 = vector.broadcast %9 : vector<1x32xf32> to vector<16x32xf32>
      %30 = arith.mulf %28, %29 : vector<16x32xf32>
      %31 = vector.broadcast %10 : vector<1x32xf32> to vector<16x32xf32>
      %32 = arith.addf %30, %31 : vector<16x32xf32>
      %33 = arith.truncf %32 : vector<16x32xf32> to vector<16x32xbf16>
      %c0_17 = arith.constant 0 : index
      %c0_18 = arith.constant 0 : index
      %34 = vector.load %arg7[%c0_17, %c0_18] : memref<16x32xbf16, #tpu.memory_space<vmem>>, vector<16x32xbf16>
      tpu.vector_store %arg7[%c0_17, %c0_18], %33 {strides = array<i32>} : memref<16x32xbf16, #tpu.memory_space<vmem>>, vector<16x32xbf16>,
    } else {
    }
    %c0 = arith.constant 0 : index
    %c0_1 = arith.constant 0 : index
    %3 = vector.load %arg7[%c0, %c0_1] : memref<16x32xbf16, #tpu.memory_space<vmem>>, vector<16x32xbf16>
    %c0_2 = arith.constant 0 : index
    %c0_3 = arith.constant 0 : index
    %4 = vector.load %arg5[%c0_2, %c0_3] : memref<32x64xbf16, #tpu.memory_space<vmem>>, vector<32x64xbf16>
    %cst = arith.constant dense<0.000000e+00> : vector<16x64xf32>
    %5 = tpu.matmul %3, %4, %cst {dimension_numbers = #tpu.dot_dimension_numbers<[1], [0], [0], [1], [0, 0, 1, 1], [], []>} : vector<16x32xbf16>, vector<32x64xbf16>, vector<16x64xf32> -> vector<16x64xf32>
    %6 = arith.truncf %5 : vector<16x64xf32> to vector<16x64xbf16>
    %c0_4 = arith.constant 0 : index
    %c0_5 = arith.constant 0 : index
    %7 = vector.load %arg6[%c0_4, %c0_5] : memref<16x64xbf16, #tpu.memory_space<vmem>>, vector<16x64xbf16>
    tpu.vector_store %arg6[%c0_4, %c0_5], %6 {strides = array<i32>} : memref<16x64xbf16, #tpu.memory_space<vmem>>, vector<16x64xbf16>,
    return
  }
  func.func @transform_0(%arg0: i32, %arg1: i32) -> (i32, i32) {
    %c0_i32 = arith.constant 0 : i32
    %c0_i32_0 = arith.constant 0 : i32
    return %arg0, %c0_i32 : i32, i32
  }
  func.func @transform_1(%arg0: i32, %arg1: i32) -> (i32, i32) {
    %c0_i32 = arith.constant 0 : i32
    %c0_i32_0 = arith.constant 0 : i32
    %c0_i32_1 = arith.constant 0 : i32
    return %c0_i32, %c0_i32_0 : i32, i32
  }
  func.func @transform_2(%arg0: i32, %arg1: i32) -> (i32, i32) {
    %c0_i32 = arith.constant 0 : i32
    %c0_i32_0 = arith.constant 0 : i32
    %c0_i32_1 = arith.constant 0 : i32
    return %c0_i32, %c0_i32_0 : i32, i32
  }
  func.func @transform_3(%arg0: i32, %arg1: i32) -> (i32, i32) {
    %c0_i32 = arith.constant 0 : i32
    %c0_i32_0 = arith.constant 0 : i32
    return %c0_i32, %arg1 : i32, i32
  }
  func.func @transform_4(%arg0: i32, %arg1: i32) -> (i32, i32) {
    %c0_i32 = arith.constant 0 : i32
    return %arg0, %arg1 : i32, i32
  }
}

</mosaic_0001>

<bundles_post_ra>
// kernel: fwd.13
= control target key start
LH: loop header
LB: loop body
LE: loop exit
PB: predicated region body
PF: predicated region fallthrough
CT: control target
= control target key end

     0   :  { %vm27_vm0 = vcmask 261120   ;;  %s283_s0 = inlined_call_operand.vmem [shape: f32[16,32], index: 0, kind: input, shape index: {}]   ;;  %s284_s1 = inlined_call_operand.vmem [shape: f32[1,32], index: 1, kind: input, shape index: {}]   ;;  %s285_s2 = inlined_call_operand.vmem [shape: f32[1,32], index: 2, kind: input, shape index: {}]   ;;  %s286_s3 = inlined_call_operand.vmem [shape: bf16[32,64], index: 3, kind: input, shape index: {}]   ;;  %s287_s4 = inlined_call_operand.hbm [shape: bf16[16,64], index: 4, kind: output, shape index: {}]  }
   0x1   :  { %v23_v0 = vld [vmem:[%s283_s0] sm:$0xff]  ;;  %v24_v1 = vld [vmem:[%s283_s0 + $0x8] sm:$0xff] }
   0x2   :  { %v28_v2 = vsel %vm27_vm0, %v23_v0, 0.0 }
   0x3   :  { %29 = vadd.xlane.f32.xlu0 %v28_v2 }
   0x4   :  { %9 = vsyncpa [#allocation4], 0  ;;  %v31_v3 = vsel %vm27_vm0, %v24_v1, 0.0  ;;  %v187_v14 = vld [vmem:[%s286_s3] sm:$0xff]   ;;  %v217_v15 = vmov 0.0   ;;  %v188_v16 = vld [vmem:[%s286_s3 + $0x8] sm:$0xff]  }
   0x5   :  { %174 = vmatprep.subr.bf16.mxu0 %v217_v15  ;;  %vm218_vm1 = vmmov 0   ;;  %v162_v25 = vld [vmem:[%s284_s1] ss:$0 sm:$0xff]  ;;  %s219_s25 = smov [#allocation3]   ;;  %vm143_vm2 = vcmask 519168  }
   0x6   :  { %175 = vmatpush3.bf16.msra.mxu0 %v187_v14  ;;  %178 = vmatprep.mubr.msk.bf16.mxu0 %vm218_vm1, %v217_v15  ;;  %v163_v29 = vld [vmem:[%s285_s2] ss:$0 sm:$0xff]  ;;  %s151_s26 = sshll.u32 %s219_s25, 4  ;;  %s152_s26 = int_to_ptr.vmem [resolvable:$true] %s151_s26 }
   0x7   :  { %32 = vadd.xlane.f32.xlu0 %v31_v3  ;;  %176 = vmatprep.subr.bf16.mxu0 %v217_v15  ;;  %s193_s1 = scalar_lea.vmem %s152_s26, 128  ;;  %p198_p1 = scmp.lt.s32.totalorder %s152_s26, %s152_s26 }
   0x8   :  { %p194_p0 = scmp.ne.s32.totalorder %s152_s26, %s193_s1  ;;  %p199_p2 = scmp.lt.s32.totalorder %s193_s1, %s193_s1 }
   0xa   :  { %177 = vmatpush3.bf16.msra.mxu0 %v188_v16  ;;  %p200_p3 = por %p199_p2, %p198_p1 }
   0xc   :  { %p201_p4 = pnand %p200_p3, %p194_p0 }
  0x90   :  { %v30_v4 = vpop.xlane.xlu0 %29 }
  0x91   :  { %v35_v5 = vmul.f32 0.03125, %v30_v4 }
  0x93   :  { %v37_v6 = vsub.f32 %v23_v0, %v35_v5 }
  0x94   :  { %v33_v7 = vpop.xlane.xlu0 %32 }
  0x95   :  { %v36_v8 = vmul.f32 0.03125, %v33_v7  ;;  %v39_v9 = vmul.f32 %v37_v6, %v37_v6 }
  0x97   :  { %v38_v10 = vsub.f32 %v24_v1, %v36_v8  ;;  %v41_v11 = vsel %vm27_vm0, %v39_v9, 0.0 }
  0x98   :  { %42 = vadd.xlane.f32.xlu1 %v41_v11 }
  0x99   :  { %v40_v12 = vmul.f32 %v38_v10, %v38_v10 }
  0x9b   :  { %v44_v13 = vsel %vm27_vm0, %v40_v12, 0.0 }
  0x9c   :  { %45 = vadd.xlane.f32.xlu1 %v44_v13 }
 0x125   :  { %v43_v17 = vpop.xlane.xlu1 %42 }
 0x126   :  { %v47_v18 = vmul.f32 0.03125, %v43_v17 }
 0x128   :  { %v49_v19 = vadd.f32 1e-05, %v47_v18 }
 0x129   :  { %v46_v20 = vpop.xlane.xlu1 %45 }
 0x12a   :  { %189 = vrsqrt.f32 %v49_v19  ;;  %v48_v21 = vmul.f32 0.03125, %v46_v20 }
 0x12c   :  { %v50_v22 = vadd.f32 1e-05, %v48_v21 }
 0x12e   :  { %191 = vrsqrt.f32 %v50_v22 }
 0x134   :  { %v190_v23 = vpop.eup %189 }
 0x135   :  { %v53_v24 = vmul.f32 %v190_v23, %v37_v6 }
 0x137   :  { %v61_v27 = vmul.f32 %v162_v25, %v53_v24 }
 0x138   :  { %v192_v26 = vpop.eup %191 }
 0x139   :  { %v54_v28 = vmul.f32 %v192_v26, %v38_v10  ;;  %v69_v31 = vadd.f32 %v163_v29, %v61_v27 }
 0x13b   :  { %v62_v30 = vmul.f32 %v162_v25, %v54_v28 }
 0x13d   :  { %v70_v32 = vadd.f32 %v163_v29, %v62_v30 }
 0x13f   :  { %v71_v33 = vpack.c.bf16 %v70_v32, %v69_v31 }
 0x141   :  { %72 = vst.msk [vmem:[#allocation2] sm:$0xff] %vm27_vm0, %v71_v33 }
 0x148   :  { %v73_v34 = vld [vmem:[#allocation2] sm:$0xff] }
 0x149   :  { %179 = vmatmul.mubr.msk.bf16.vlgmr.msra.gmra.mrb[0].mxu0 %vm27_vm0, %v73_v34 }
 0x21c   :  { %v128_v35 = vpop.f32.mrb[0].mxu0 }
 0x21d   :  { %v169_v36 = vpack.c.bf16 %v128_v35, %v128_v35  ;;  %v180_v37 = vpop.f32.mrb[1].mxu0 }
 0x21e   :  { %v131_v38 = vpop.f32.mrb[2].mxu0 }
 0x21f   :  { %144 = vst.msk [vmem:[#allocation3] sm:$0xf] %vm143_vm2, %v169_v36  ;;  %v170_v39 = vpack.c.bf16 %v131_v38, %v131_v38  ;;  %v181_v40 = vpop.f32.mrb[3].mxu0 }
 0x221   :  { %145 = vst.msk [vmem:[#allocation3 + $0x4] sm:$0xf] %vm143_vm2, %v170_v39 }
 0x222   :  { %204 = shalt.err (!%p201_p4)
}
 0x223   :  { %s205_s28 = scalar_lea.hbm %s287_s4, 128 }
 0x224   :  { %p206_p5 = scmp.ne.s32.totalorder %s287_s4, %s205_s28  ;;  %p209_p6 = scmp.lt.u32.totalorder %s205_s28, %s287_s4 }
 0x226   :  { %p211_p7 = pnand %p209_p6, %p206_p5 }
 0x228   :  { %214 = shalt.err (!%p211_p7)
}
 0x229   :  { %s220_s7 = smov 64   ;;  %s221_s8 = smov 4  }
 0x22a   :  { %157 = dma.vmem_to_hbm [thread:$0]  %s152_s26, 128, %s287_s4, [#allocation4], %s220_s7, %s220_s7, %s221_s8  }
 0x22b   :  { %215 = dma.done.wait [#allocation4], 128  }
 0x22c   :  { %216 = vsyncadd [#allocation4], 4294967168 }
 0x22d   :  { %161 = vsyncpa [#allocation4], 1 }

// kernel: fwd.9
= control target key start
LH: loop header
LB: loop body
LE: loop exit
PB: predicated region body
PF: predicated region fallthrough
CT: control target
= control target key end

     0   :  { %vm35_vm0 = vcmask 261120   ;;  %v377_v18 = vmov 0.0   ;;  %vm378_vm1 = vmmov 0   ;;  %s485_s0 = inlined_call_operand.vmem [shape: f32[16,32], index: 0, kind: input, shape index: {}, may-alias: {0,7}]   ;;  %s486_s6 = inlined_call_operand.vmem [shape: f32[1,32], index: 6, kind: input, shape index: {}]   ;;  %s487_s3 = inlined_call_operand.vmem [shape: bf16[32,128], index: 3, kind: input, shape index: {}]   ;;  %s488_s1 = inlined_call_operand.vmem [shape: f32[1,32], index: 1, kind: input, shape index: {}]   ;;  %s489_s2 = inlined_call_operand.vmem [shape: f32[1,32], index: 2, kind: input, shape index: {}]   ;;  %s490_s5 = inlined_call_operand.vmem [shape: bf16[128,32], index: 5, kind: input, shape index: {}]   ;;  %s491_s4 = inlined_call_operand.vmem [shape: f32[1,128], index: 4, kind: input, shape index: {}]   ;;  %s492_s7 = inlined_call_operand.vmem [shape: f32[16,32], index: 7, kind: output, shape index: {}, may-alias: {0,7}]  }
   0x1   :  { %v31_v0 = vld [vmem:[%s485_s0] sm:$0xff]  ;;  %v32_v2 = vld [vmem:[%s485_s0 + $0x8] sm:$0xff]  ;;  %329 = vmatprep.subr.bf16.mxu0 %v377_v18  ;;  %337 = vmatprep.subr.bf16.mxu1 %v377_v18  ;;  %v363_v40 = vld [vmem:[%s490_s5 + $0x10] sm:$0xff]  }
   0x2   :  { %v304_v1 = vld [vmem:[%s486_s6] ss:$0 sm:$0xff]  ;;  %v36_v3 = vsel %vm35_vm0, %v31_v0, 0.0  ;;  %v39_v6 = vsel %vm35_vm0, %v32_v2, 0.0  ;;  %v360_v19 = vld [vmem:[%s487_s3 + $0x8] sm:$0xff]   ;;  %333 = vmatprep.mubr.msk.bf16.mxu0 %vm378_vm1, %v377_v18  ;;  %353 = vmatprep.mubr.msk.bf16.mxu1 %vm378_vm1, %v377_v18  ;;  %v364_v41 = vld [vmem:[%s490_s5 + $0x18] sm:$0xff]  }
   0x3   :  { %v88_v4 = vadd.f32 %v304_v1, %v31_v0  ;;  %v89_v5 = vadd.f32 %v304_v1, %v32_v2  ;;  %37 = vadd.xlane.f32.xlu0 %v36_v3  ;;  %v359_v17 = vld [vmem:[%s487_s3] sm:$0xff]   ;;  %v362_v39 = vld [vmem:[%s490_s5 + $0x8] sm:$0xff]   ;;  %v367_v44 = vld [vmem:[%s490_s5 + $0x30] sm:$0xff]  }
   0x4   :  { %330 = vmatpush3.bf16.msra.mxu0 %v359_v17  ;;  %v302_v28 = vld [vmem:[%s488_s1] ss:$0 sm:$0xff]  ;;  %v366_v43 = vld [vmem:[%s490_s5 + $0x28] sm:$0xff]   ;;  %v368_v45 = vld [vmem:[%s490_s5 + $0x38] sm:$0xff]  }
   0x5   :  { %90 = vst.msk [vmem:[#allocation3] sm:$0xff] %vm35_vm0, %v88_v4  ;;  %91 = vst.msk [vmem:[#allocation3 + $0x8] sm:$0xff] %vm35_vm0, %v89_v5  ;;  %331 = vmatprep.subr.bf16.mxu0 %v377_v18  ;;  %v303_v32 = vld [vmem:[%s489_s2] ss:$0 sm:$0xff] }
   0x6   :  { %v361_v38 = vld [vmem:[%s490_s5] sm:$0xff]  }
   0x7   :  { %40 = vadd.xlane.f32.xlu0 %v39_v6  ;;  %338 = vmatpush3.bf16.msra.mxu1 %v361_v38  ;;  %v365_v42 = vld [vmem:[%s490_s5 + $0x20] sm:$0xff]  }
   0x8   :  { %332 = vmatpush3.bf16.msra.mxu0 %v360_v19  ;;  %339 = vmatprep.subr.bf16.mxu1 %v377_v18  ;;  %v305_v46 = vld [vmem:[%s491_s4] ss:$0 sm:$0xff] }
   0xb   :  { %340 = vmatpush3.bf16.msra.mxu1 %v362_v39 }
   0xc   :  { %341 = vmatprep.subr.bf16.mxu1 %v377_v18 }
   0xf   :  { %342 = vmatpush3.bf16.msra.mxu1 %v363_v40 }
  0x10   :  { %343 = vmatprep.subr.bf16.mxu1 %v377_v18 }
  0x13   :  { %344 = vmatpush3.bf16.msra.mxu1 %v364_v41 }
  0x14   :  { %345 = vmatprep.subr.bf16.mxu1 %v377_v18 }
  0x17   :  { %346 = vmatpush3.bf16.msra.mxu1 %v365_v42 }
  0x18   :  { %347 = vmatprep.subr.bf16.mxu1 %v377_v18 }
  0x1b   :  { %348 = vmatpush3.bf16.msra.mxu1 %v366_v43 }
  0x1c   :  { %349 = vmatprep.subr.bf16.mxu1 %v377_v18 }
  0x1f   :  { %350 = vmatpush3.bf16.msra.mxu1 %v367_v44 }
  0x20   :  { %351 = vmatprep.subr.bf16.mxu1 %v377_v18 }
  0x23   :  { %352 = vmatpush3.bf16.msra.mxu1 %v368_v45 }
  0x90   :  { %v38_v7 = vpop.xlane.xlu0 %37 }
  0x91   :  { %v43_v8 = vmul.f32 0.03125, %v38_v7 }
  0x93   :  { %v45_v9 = vsub.f32 %v31_v0, %v43_v8  ;;  %v179_v8 = vld [vmem:[#allocation3] sm:$0xff] }
  0x94   :  { %v41_v10 = vpop.xlane.xlu0 %40 }
  0x95   :  { %v44_v11 = vmul.f32 0.03125, %v41_v10  ;;  %v47_v12 = vmul.f32 %v45_v9, %v45_v9  ;;  %v180_v10 = vld [vmem:[#allocation3 + $0x8] sm:$0xff] }
  0x97   :  { %v46_v13 = vsub.f32 %v32_v2, %v44_v11  ;;  %v49_v14 = vsel %vm35_vm0, %v47_v12, 0.0 }
  0x98   :  { %50 = vadd.xlane.f32.xlu1 %v49_v14 }
  0x99   :  { %v48_v15 = vmul.f32 %v46_v13, %v46_v13 }
  0x9b   :  { %v52_v16 = vsel %vm35_vm0, %v48_v15, 0.0 }
  0x9c   :  { %53 = vadd.xlane.f32.xlu1 %v52_v16 }
 0x125   :  { %v51_v20 = vpop.xlane.xlu1 %50 }
 0x126   :  { %v55_v21 = vmul.f32 0.03125, %v51_v20 }
 0x128   :  { %v57_v22 = vadd.f32 1e-05, %v55_v21 }
 0x129   :  { %v54_v23 = vpop.xlane.xlu1 %53 }
 0x12a   :  { %369 = vrsqrt.f32 %v57_v22  ;;  %v56_v24 = vmul.f32 0.03125, %v54_v23 }
 0x12c   :  { %v58_v25 = vadd.f32 1e-05, %v56_v24 }
 0x12e   :  { %371 = vrsqrt.f32 %v58_v25 }
 0x134   :  { %v370_v26 = vpop.eup %369 }
 0x135   :  { %v61_v27 = vmul.f32 %v370_v26, %v45_v9 }
 0x137   :  { %v69_v30 = vmul.f32 %v302_v28, %v61_v27 }
 0x138   :  { %v372_v29 = vpop.eup %371 }
 0x139   :  { %v62_v31 = vmul.f32 %v372_v29, %v46_v13  ;;  %v77_v34 = vadd.f32 %v303_v32, %v69_v30 }
 0x13b   :  { %v70_v33 = vmul.f32 %v302_v28, %v62_v31 }
 0x13d   :  { %v78_v35 = vadd.f32 %v303_v32, %v70_v33 }
 0x13f   :  { %v79_v36 = vpack.c.bf16 %v78_v35, %v77_v34 }
 0x141   :  { %80 = vst.msk [vmem:[#allocation2] sm:$0xff] %vm35_vm0, %v79_v36 }
 0x148   :  { %v92_v37 = vld [vmem:[#allocation2] sm:$0xff] }
 0x149   :  { %334 = vmatmul.mubr.msk.bf16.vlgmr.msra.gmra.mrb[0].mxu0 %vm35_vm0, %v92_v37 }
 0x21c   :  { %v154_v47 = vpop.f32.mrb[0].mxu0 }
 0x21d   :  { %v155_v48 = vadd.f32 %v305_v46, %v154_v47  ;;  %v335_v49 = vpop.f32.mrb[1].mxu0 }
 0x21e   :  { %v157_v50 = vpop.f32.mrb[2].mxu0 }
 0x21f   :  { %v163_v51 = vmul.f32 0.044715, %v155_v48  ;;  %v158_v52 = vadd.f32 %v305_v46, %v157_v50  ;;  %v336_v53 = vpop.f32.mrb[3].mxu0  ;;  %v161_v2 = vmul.f32 0.5, %v155_v48 }
 0x221   :  { %v165_v54 = vmul.f32 %v163_v51, %v155_v48  ;;  %v164_v55 = vmul.f32 0.044715, %v158_v52  ;;  %v162_v3 = vmul.f32 0.5, %v158_v52 }
 0x223   :  { %v167_v56 = vmul.f32 %v165_v54, %v155_v48  ;;  %v166_v57 = vmul.f32 %v164_v55, %v158_v52 }
 0x225   :  { %v168_v58 = vmul.f32 %v166_v57, %v158_v52  ;;  %v169_v59 = vadd.f32 %v167_v56, %v155_v48 }
 0x227   :  { %v170_v60 = vadd.f32 %v168_v58, %v158_v52  ;;  %v171_v61 = vmul.f32 0.7978846, %v169_v59 }
 0x229   :  { %v172_v62 = vmul.f32 0.7978846, %v170_v60  ;;  %373 = vtanh.f32 %v171_v61 }
 0x22b   :  { %375 = vtanh.f32 %v172_v62 }
 0x233   :  { %v374_v63 = vpop.eup %373 }
 0x234   :  { %v175_v0 = vadd.f32 1.0, %v374_v63 }
 0x235   :  { %v376_v1 = vpop.eup %375 }
 0x236   :  { %v176_v4 = vadd.f32 1.0, %v376_v1  ;;  %v177_v5 = vmul.f32 %v175_v0, %v161_v2 }
 0x238   :  { %v178_v6 = vmul.f32 %v176_v4, %v162_v3 }
 0x23a   :  { %v181_v7 = vpack.c.bf16 %v178_v6, %v177_v5 }
 0x23c   :  { %354 = vmatmul.mubr.bf16.vlgmr.msra.gmra.mrb[0].mxu1 %v181_v7 }
 0x30f   :  { %v280_v9 = vpop.f32.mrb[0].mxu1 }
 0x310   :  { %v287_v11 = vadd.f32 %v280_v9, %v179_v8  ;;  %v355_v12 = vpop.f32.mrb[1].mxu1 }
 0x311   :  { %v283_v13 = vpop.f32.mrb[2].mxu1 }
 0x312   :  { %289 = vst.msk [vmem:[#allocation3] sm:$0xff] %vm35_vm0, %v287_v11  ;;  %v288_v14 = vadd.f32 %v283_v13, %v180_v10  ;;  %v356_v15 = vpop.f32.mrb[3].mxu1 }
 0x314   :  { %290 = vst.msk [vmem:[#allocation3 + $0x8] sm:$0xff] %vm35_vm0, %v288_v14 }
 0x319   :  { %v294_v16 = vld [vmem:[#allocation3] sm:$0xff] }
 0x31a   :  { %296 = vst.msk [vmem:[%s492_s7] sm:$0xff] %vm35_vm0, %v294_v16 }
 0x31b   :  { %v295_v17 = vld [vmem:[#allocation3 + $0x8] sm:$0xff] }
 0x31c   :  { %297 = vst.msk [vmem:[%s492_s7 + $0x8] sm:$0xff] %vm35_vm0, %v295_v17 }

// kernel: fwd.7
= control target key start
LH: loop header
LB: loop body
LE: loop exit
PB: predicated region body
PF: predicated region fallthrough
CT: control target
= control target key end

     0   :  { %s742_s24 = smov 0   ;;  %s744_s25 = smov 0   ;;  %s803_s0 = inlined_call_operand.vmem [shape: f32[2,8,32], index: 0, kind: input, shape index: {}]   ;;  %s804_s1 = inlined_call_operand.vmem [shape: f32[1,32], index: 1, kind: input, shape index: {}]   ;;  %s805_s2 = inlined_call_operand.vmem [shape: f32[1,32], index: 2, kind: input, shape index: {}]   ;;  %s806_s3 = inlined_call_operand.vmem [shape: bf16[32,96], index: 3, kind: input, shape index: {}]   ;;  %s807_s4 = inlined_call_operand.vmem [shape: f32[1,96], index: 4, kind: input, shape index: {}]   ;;  %s808_s5 = inlined_call_operand.vmem [shape: bf16[2,8,32], index: 5, kind: output, shape index: {0}]   ;;  %s809_s6 = inlined_call_operand.vmem [shape: bf16[2,8,32], index: 6, kind: output, shape index: {1}]   ;;  %s810_s7 = inlined_call_operand.vmem [shape: bf16[2,8,32], index: 7, kind: output, shape index: {2}]  }
   0x1   :  { %s746_s26 = smov 0  }
   0x2 LB: > { %s30_s27 = sadd.s32 1, %s692_s25  ;;  %p616_p0 = scmp.ge.s32.totalorder %s696_s26, 1  ;;  %s696_s26 = sphi %s746_s26, %s18_s26   ;;  %s692_s25 = sphi %s744_s25, %s812_s25   ;;  %s688_s24 = sphi %s742_s24, %s811_s24  }
   0x3   : > { %p32_p1 = scmp.ge.s32.totalorder %s30_s27, 2  ;;  %p264_p2 = scmp.lt.s32.totalorder %s696_s26, 3 }
   0x5   : > { %s814_s27 = smov (%p32_p1, %s30_s27), 0  ;;  %p265_p3 = pnand %p616_p0, %p264_p2 }
   0x6   : > { %p314_p4 = scmp.lt.s32.totalorder (!%p265_p3), %s688_s24, 1  ;;  %vm346_vm0 = vcmask (!%p265_p3), 261120   ;;  %v670_v7 = vld [vmem:[%s806_s3] sm:$0xff] (!%p265_p3)   ;;  %v698_v8 = vmov (!%p265_p3), 0.0   ;;  %v671_v9 = vld [vmem:[%s806_s3 + $0x8] sm:$0xff] (!%p265_p3)   ;;  %vm699_vm1 = vmmov (!%p265_p3), 0  }
   0x7   : > { %268 = sbr.rel (%p265_p3) target bundleno = 669 (0x29d), region = 40  ;;  %634 = vmatprep.subr.bf16.mxu0 (!%p265_p3), %v698_v8  ;;  %638 = vmatprep.mubr.msk.bf16.mxu0 (!%p265_p3), %vm699_vm1, %v698_v8  ;;  %v621_v14 = vld [vmem:[%s804_s1] ss:$0 sm:$0xff] (!%p265_p3)  ;;  %vm443_vm2 = vcmask (!%p265_p3), 257024   ;;  %s700_s23 = smov (!%p265_p3), 96  }
   0x8   : > { %635 = vmatpush3.bf16.msra.mxu0 (!%p265_p3), %v670_v7  ;;  %v622_v16 = vld [vmem:[%s805_s2] ss:$0 sm:$0xff] (!%p265_p3) }
   0x9   : > { %636 = vmatprep.subr.bf16.mxu0 (!%p265_p3), %v698_v8  ;;  %v623_v20 = vld [vmem:[%s807_s4] ss:$0 sm:$0xff] (!%p265_p3) }
   0xc   : > { %637 = vmatpush3.bf16.msra.mxu0 (!%p265_p3), %v671_v9 }
   0xe   : > { %s816_s24 = smov (!%p314_p4, %s688_s24), 1 }
   0xf   : > { %s617_s28 = sshll.u32 %s816_s24, 3  ;;  %s618_s19 = sshll.u32 %s816_s24, 2 }
  0x10   : > { %s320_s8 = scalar_lea.vmem %s803_s0, %s617_s28  ;;  %s327_s22 = scalar_lea.vmem %s808_s5, %s618_s19 }
  0x11   : > { %v343_v0 = vld [vmem:[%s320_s8] sm:$0xff]  ;;  %s701_s28 = smov 64   ;;  %s334_s24 = scalar_lea.vmem %s809_s6, %s618_s19 }
  0x12   : > { %v347_v1 = vsel %vm346_vm0, %v343_v0, 0.0  ;;  %s341_s10 = scalar_lea.vmem %s810_s7, %s618_s19 }
  0x13   : > { %348 = vadd.xlane.f32.xlu0 %v347_v1 }
  0xa0   : > { %v349_v2 = vpop.xlane.xlu0 %348 }
  0xa1   : > { %v351_v3 = vmul.f32 0.03125, %v349_v2 }
  0xa3   : > { %v352_v4 = vsub.f32 %v343_v0, %v351_v3 }
  0xa5   : > { %v353_v5 = vmul.f32 %v352_v4, %v352_v4 }
  0xa7   : > { %v354_v6 = vsel %vm346_vm0, %v353_v5, 0.0 }
  0xa8   : > { %355 = vadd.xlane.f32.xlu0 %v354_v6 }
 0x135   : > { %v356_v10 = vpop.xlane.xlu0 %355 }
 0x136   : > { %v357_v11 = vmul.f32 0.03125, %v356_v10 }
 0x138   : > { %v358_v12 = vadd.f32 1e-05, %v357_v11 }
 0x13a   : > { %672 = vrsqrt.f32 %v358_v12 }
 0x144   : > { %v673_v13 = vpop.eup %672 }
 0x145   : > { %v360_v15 = vmul.f32 %v673_v13, %v352_v4 }
 0x147   : > { %v367_v17 = vmul.f32 %v621_v14, %v360_v15 }
 0x149   : > { %v374_v18 = vadd.f32 %v622_v16, %v367_v17 }
 0x14b   : > { %v375_v19 = vpack.c.bf16 %v374_v18, %v374_v18 }
 0x14d   : > { %639 = vmatmul.mubr.msk.bf16.vlgmr.msra.gmra.mrb[0].mxu0 %vm346_vm0, %v375_v19 }
 0x220   : > { %v436_v21 = vpop.f32.mrb[0].mxu0 }
 0x221   : > { %v437_v22 = vadd.f32 %v623_v20, %v436_v21  ;;  %v640_v23 = vpop.f32.mrb[1].mxu0 }
 0x222   : > { %v439_v24 = vpop.f32.mrb[2].mxu0 }
 0x223   : > { %v442_v25 = vpack.c.bf16 %v437_v22, %v437_v22  ;;  %v641_v26 = vpop.f32.mrb[3].mxu0 }
 0x225   : > { %448 = vrot.lane.b32.xlu1 %v442_v25, %s700_s23  ;;  %444 = vst.msk [vmem:[%s327_s22] sm:$0xf] %vm443_vm2, %v442_v25 }
 0x229   : > { %452 = vrot.lane.b32.xlu1 %v442_v25, %s701_s28 }
 0x297   : > { %v449_v27 = vpop.permute.xlu1 %448 }
 0x298   : > { %451 = vst.msk [vmem:[%s334_s24] sm:$0xf] %vm443_vm2, %v449_v27 }
 0x29b   : > { %v453_v28 = vpop.permute.xlu1 %452 }
 0x29c   : > { %455 = vst.msk [vmem:[%s341_s10] sm:$0xf] %vm443_vm2, %v453_v28 }
 0x29d PF: > { %s18_s26 = sadd.s32 1, %s696_s26   ;;  %s811_s24 = smov %s692_s25 }
 0x29e   : > { %p15_p5 = scmp.ge.s32.totalorder %s18_s26, 4   ;;  %s812_s25 = smov %s814_s27 }
 0x2a0   :  { %17 = sbr.rel (!%p15_p5) target bundleno = 2 (0x2), region = 94 }

// kernel: fwd.8
= control target key start
LH: loop header
LB: loop body
LE: loop exit
PB: predicated region body
PF: predicated region fallthrough
CT: control target
= control target key end

     0   :  { %s1448_s21 = smov 0   ;;  %s1450_s22 = smov 0   ;;  %s1663_s0 = inlined_call_operand.vmem [shape: f32[2,8,32], index: 0, kind: input, shape index: {}, may-alias: {0,6}]   ;;  %s1664_s1 = inlined_call_operand.vmem [shape: bf16[2,8,32], index: 1, kind: input, shape index: {}]   ;;  %s1665_s2 = inlined_call_operand.vmem [shape: bf16[2,8,32], index: 2, kind: input, shape index: {}]   ;;  %s1666_s3 = inlined_call_operand.vmem [shape: bf16[2,8,32], index: 3, kind: input, shape index: {}]   ;;  %s1667_s4 = inlined_call_operand.vmem [shape: bf16[32,32], index: 4, kind: input, shape index: {}]   ;;  %s1668_s5 = inlined_call_operand.vmem [shape: f32[1,32], index: 5, kind: input, shape index: {}]   ;;  %s1669_s6 = inlined_call_operand.vmem [shape: f32[2,8,32], index: 6, kind: output, shape index: {}, may-alias: {0,6}]  }
   0x1   :  { %s1452_s23 = smov 0  }
   0x2 LB: > { %s35_s24 = sadd.s32 1, %s1394_s22  ;;  %p1206_p0 = scmp.ge.s32.totalorder %s1398_s23, 1  ;;  %s1398_s23 = sphi %s1452_s23, %s16_s23   ;;  %s1394_s22 = sphi %s1450_s22, %s1671_s22   ;;  %s1390_s21 = sphi %s1448_s21, %s1670_s21  }
   0x3   : > { %p37_p1 = scmp.ge.s32.totalorder %s35_s24, 2  ;;  %p279_p2 = scmp.lt.s32.totalorder %s1398_s23, 3 }
   0x5   : > { %s1673_s24 = smov (%p37_p1, %s35_s24), 0  ;;  %p280_p3 = pnand %p1206_p0, %p279_p2 }
   0x6   : > { %p334_p4 = scmp.lt.s32.totalorder (!%p280_p3), %s1390_s21, 1  ;;  %v1400_v0 = vmov (!%p280_p3), 0.0   ;;  %vm1401_vm0 = vmmov (!%p280_p3), 0   ;;  %vm398_vm1 = vcmask (!%p280_p3), 64512   ;;  %vm374_vm2 = vcmask (!%p280_p3), 31744   ;;  %s1404_s8 = smov (!%p280_p3), 120  }
   0x7   : > { %283 = sbr.rel (%p280_p3) target bundleno = 1652 (0x674), region = 44  ;;  %1248 = vmatprep.subr.bf16.mxu0 (!%p280_p3), %v1400_v0  ;;  %1250 = vmatprep.mubr.msk.bf16.mxu0 (!%p280_p3), %vm1401_vm0, %v1400_v0  ;;  %v1402_v4 = vmov (!%p280_p3), -1e+30   ;;  %376 = vst.msk [vmem:[#allocation3] sm:$0xff] (!%p280_p3), %vm374_vm2, %v1400_v0  ;;  %v389_v5 = vlaneseq (!%p280_p3)  ;;  %v1403_v15 = vmov (!%p280_p3), 0   ;;  %s1405_s9 = smov (!%p280_p3), 112  }
   0x8   : > { %1254 = vmatprep.subr.bf16.mxu1 (!%p280_p3), %v1400_v0  ;;  %1256 = vmatprep.mubr.msk.bf16.mxu1 (!%p280_p3), %vm1401_vm0, %v1400_v0  ;;  %375 = vst.msk [vmem:[#allocation2] sm:$0xff] (!%p280_p3), %vm374_vm2, %v1402_v4  ;;  %s1406_s10 = smov (!%p280_p3), 104   ;;  %vm469_vm4 = vcmask (!%p280_p3), 7168   ;;  %vm482_vm5 = vcmask (!%p280_p3), 1043456   ;;  %v1407_v63 = vmov (!%p280_p3), 1   ;;  %vm609_vm6 = vcmask (!%p280_p3), 15368  }
   0x9   : > { %v1491_v6 = vshrl.u32 (!%p280_p3), %v389_v5, 7  ;;  %v1493_v7 = vand.u32 (!%p280_p3), 127, %v389_v5  ;;  %1341 = vset.pattern.permute.xlu0 (!%p280_p3), %v1403_v15  ;;  %1342 = vset.pattern.permute.xlu1 (!%p280_p3), %v1407_v63  ;;  %vm752_vm7 = vcmask (!%p280_p3), 23568   ;;  %vm892_vm8 = vcmask (!%p280_p3), 31768   ;;  %s1410_s14 = smov (!%p280_p3), 8   ;;  %s1411_s15 = smov (!%p280_p3), 16  }
   0xa   : > { %vm377_vm9 = vcmask (!%p280_p3), 261120   ;;  %s1412_s16 = smov (!%p280_p3), 24   ;;  %vm675_vm10 = vcmask (!%p280_p3), 130112   ;;  %vm815_vm11 = vcmask (!%p280_p3), 195712   ;;  %vm955_vm12 = vcmask (!%p280_p3), 261312  }
   0xb   : > { %vm397_vm3 = vcmp.ge.s32.totalorder (!%p280_p3), %v1491_v6, %v1493_v7  ;;  %v1409_v7 = vmov (!%p280_p3), 3   ;;  %378 = vst.msk [vmem:[#allocation4] sm:$0xff] (!%p280_p3), %vm377_vm9, %v1400_v0  ;;  %vm971_vm13 = vcmask (!%p280_p3), 60416   ;;  %vm983_vm14 = vcmask (!%p280_p3), 126016  }
   0xc   : > { %vm995_vm15 = vcmask (!%p280_p3), 191616  }
   0xe   : > { %s1675_s21 = smov (!%p334_p4, %s1390_s21), 1 }
   0xf   : > { %s1475_s25 = sshll.u32 %s1675_s21, 2  ;;  %v1508_v18 = vld [vmem:[#allocation2] sm:$0xff] }
  0x10   : > { %s354_s28 = scalar_lea.vmem %s1665_s2, %s1475_s25  ;;  %s347_s7 = scalar_lea.vmem %s1664_s1, %s1475_s25 }
  0x11   : > { %v387_v1 = vld [vmem:[%s354_s28] sm:$0xf]  ;;  %s361_s13 = scalar_lea.vmem %s1666_s3, %s1475_s25  ;;  %s1207_s25 = sshll.u32 %s1675_s21, 3 }
  0x12   : > { %v403_v2 = vsel %vm398_vm1, %v387_v1, 0  ;;  %v386_v3 = vld [vmem:[%s347_s7] sm:$0xf]  ;;  %v1215_v16 = vcombine.low %v387_v1, %v387_v1  ;;  %v1408_v1 = vmov 2   ;;  %s340_s28 = scalar_lea.vmem %s1663_s0, %s1207_s25 }
  0x13   : > { %1249 = vmatpush3.bf16.xpose.msra.mxu0 %v403_v2  ;;  %v1214_v17 = vcombine.low %v386_v3, %v386_v3  ;;  %v1522_v22 = vld [vmem:[%s361_s13] sm:$0xf] }
  0x14   : > { %1266 = vmatprep.subr.bf16.mxu0 %v1400_v0  ;;  %537 = vrot.lane.b32.xlu1 %v1215_v16, %s1404_s8  ;;  %v484_v23 = vsel %vm482_vm5, %v1522_v22, 0  ;;  %v1217_v5 = vcombine.low %v1522_v22, %v1522_v22 }
  0x15   : > { %1255 = vmatpush3.bf16.msra.mxu1 %v484_v23 }
  0x16   : > { %1260 = vmatprep.subr.bf16.mxu1 %v1400_v0 }
  0x18   : > { %532 = vrot.lane.b32.xlu1 %v1214_v17, %s1404_s8 }
  0x1a   : > { %1251 = vmatmul.mubr.msk.bf16.vlgmr.msra.gmra.mrb[0].mxu0 %vm398_vm1, %v386_v3 }
  0x1b   : > { %1268 = vmatprep.mubr.msk.bf16.mxu0 %vm1401_vm0, %v1400_v0 }
  0x1c   : > { %680 = vrot.lane.b32.xlu1 %v1215_v16, %s1405_s9 }
  0x20   : > { %678 = vrot.lane.b32.xlu1 %v1214_v17, %s1405_s9 }
  0x24   : > { %820 = vrot.lane.b32.xlu1 %v1215_v16, %s1406_s10 }
  0x28   : > { %818 = vrot.lane.b32.xlu1 %v1214_v17, %s1406_s10 }
  0x86   : > { %v538_v27 = vpop.permute.xlu1 %537 }
  0x87   : > { %v543_v30 = vsel %vm398_vm1, %v538_v27, 0 }
  0x8a   : > { %v533_v28 = vpop.permute.xlu1 %532 }
  0x8e   : > { %v681_v32 = vpop.permute.xlu1 %680 }
  0x8f   : > { %v686_v34 = vsel %vm398_vm1, %v681_v32, 0 }
  0x92   : > { %v679_v33 = vpop.permute.xlu1 %678 }
  0x96   : > { %v821_v35 = vpop.permute.xlu1 %820 }
  0x97   : > { %v826_v36 = vsel %vm398_vm1, %v821_v35, 0 }
  0x9a   : > { %v819_v37 = vpop.permute.xlu1 %818 }
  0xed   : > { %v439_v8 = vpop.f32.mrb[0].mxu0 }
  0xee   : > { %v445_v9 = vmul.f32 0.35355338, %v439_v8  ;;  %v1252_v10 = vpop.f32.mrb[1].mxu0 }
  0xef   : > { %v442_v11 = vpop.f32.mrb[2].mxu0 }
  0xf0   : > { %v1253_v12 = vpop.f32.mrb[3].mxu0  ;;  %v446_v13 = vsel %vm397_vm3, %v445_v9, -1000000.0 }
  0xf1   : > { %v449_v14 = vsel %vm398_vm1, %v446_v13, -inf }
  0xf2   : > { %450 = vmax.xlane.f32.xlu0 %v449_v14 }
 0x17f   : > { %v451_v19 = vpop.xlane.xlu0 %450 }
 0x180   : > { %v1511_v20 = vmax.f32 %v1508_v18, %v451_v19 }
 0x182   : > { %v453_v21 = vsub.f32 %v1508_v18, %v1511_v20  ;;  %528 = vst.msk [vmem:[#allocation2] sm:$0xff] %vm469_vm4, %v1511_v20  ;;  %458 = vperm.xlu0 %1341, %v1511_v20  }
 0x186   : > { %1343 = vset.pattern.permute.xlu0 %v1408_v1 }
 0x189   : > { %v587_v3 = vld [vmem:[#allocation2] sm:$0xff] }
 0x201   : > { %v459_v24 = vpop.permute.xlu0 %458 }
 0x202   : > { %v461_v25 = vsub.f32 %v446_v13, %v459_v24 }
 0x204   : > { %v462_v26 = vmul.f32 1.442695, %v461_v25 }
 0x206   : > { %1358 = vpow2.f32 %v462_v26 }
 0x210   : > { %v1527_v29 = vpop.eup %1358 }
 0x211   : > { %v478_v31 = vpack.c.bf16 %v1527_v29, %v1527_v29  ;;  %v465_v17 = vsel %vm398_vm1, %v1527_v29, 0.0 }
 0x213   : > { %1257 = vmatmul.mubr.msk.bf16.vlgmr.msra.gmra.mrb[0].mxu1 %vm398_vm1, %v478_v31 }
 0x214   : > { %1261 = vmatpush3.bf16.xpose.msra.mxu1 %v543_v30  ;;  %1262 = vmatprep.mubr.msk.bf16.mxu1 %vm1401_vm0, %v1400_v0 }
 0x215   : > { %1272 = vmatprep.subr.bf16.mxu1 %v1400_v0 }
 0x21b   : > { %1263 = vmatmul.mubr.msk.bf16.vlgmr.msra.gmra.mrb[4].mxu1 %vm398_vm1, %v533_v28 }
 0x21c   : > { %1273 = vmatpush3.bf16.xpose.msra.mxu1 %v686_v34  ;;  %1274 = vmatprep.mubr.msk.bf16.mxu1 %vm1401_vm0, %v1400_v0 }
 0x21d   : > { %1284 = vmatprep.subr.bf16.mxu1 %v1400_v0 }
 0x223   : > { %1275 = vmatmul.mubr.msk.bf16.vlgmr.msra.gmra.mrb[8].mxu1 %vm398_vm1, %v679_v33 }
 0x224   : > { %1285 = vmatpush3.bf16.xpose.msra.mxu1 %v826_v36  ;;  %1286 = vmatprep.mubr.msk.bf16.mxu1 %vm1401_vm0, %v1400_v0 }
 0x225   : > { %1296 = vmatprep.subr.bf16.mxu1 %v1400_v0 }
 0x22b   : > { %1287 = vmatmul.mubr.msk.bf16.vlgmr.msra.gmra.mrb[12].mxu1 %vm398_vm1, %v819_v37 }
 0x22c   : > { %1300 = vmatprep.mubr.msk.bf16.mxu1 %vm1401_vm0, %v1400_v0 }
 0x2e6   : > { %v1549_v38 = vpop.f32.mrb[0].mxu1 }
 0x2e7   : > { %v1258_v39 = vpop.f32.mrb[1].mxu1 }
 0x2e8   : > { %v523_v40 = vpop.f32.mrb[2].mxu1 }
 0x2e9   : > { %v1259_v41 = vpop.f32.mrb[3].mxu1 }
 0x2ee   : > { %v579_v42 = vpop.f32.mrb[4].mxu1 }
 0x2ef   : > { %v585_v43 = vmul.f32 0.35355338, %v579_v42  ;;  %v1264_v44 = vpop.f32.mrb[5].mxu1 }
 0x2f0   : > { %v582_v45 = vpop.f32.mrb[6].mxu1 }
 0x2f1   : > { %v1265_v46 = vpop.f32.mrb[7].mxu1  ;;  %v586_v47 = vsel %vm397_vm3, %v585_v43, -1000000.0 }
 0x2f2   : > { %v589_v48 = vsel %vm398_vm1, %v586_v47, -inf }
 0x2f3   : > { %590 = vmax.xlane.f32.xlu1 %v589_v48  ;;  %v454_v48 = vmul.f32 1.442695, %v453_v21 }
 0x2f6   : > { %v722_v49 = vpop.f32.mrb[8].mxu1 }
 0x2f7   : > { %v728_v50 = vmul.f32 0.35355338, %v722_v49  ;;  %v1276_v51 = vpop.f32.mrb[9].mxu1 }
 0x2f8   : > { %v725_v52 = vpop.f32.mrb[10].mxu1 }
 0x2f9   : > { %v1277_v53 = vpop.f32.mrb[11].mxu1  ;;  %v729_v54 = vsel %vm397_vm3, %v728_v50, -1000000.0  ;;  %v448_v50 = vld [vmem:[#allocation3] sm:$0xff] }
 0x2fa   : > { %v732_v55 = vsel %vm398_vm1, %v729_v54, -inf }
 0x2fb   : > { %733 = vmax.xlane.f32.xlu0 %v732_v55 }
 0x2fe   : > { %v862_v56 = vpop.f32.mrb[12].mxu1 }
 0x2ff   : > { %v868_v57 = vmul.f32 0.35355338, %v862_v56  ;;  %v1288_v58 = vpop.f32.mrb[13].mxu1 }
 0x300   : > { %v865_v59 = vpop.f32.mrb[14].mxu1 }
 0x301   : > { %v1289_v60 = vpop.f32.mrb[15].mxu1  ;;  %v869_v61 = vsel %vm397_vm3, %v868_v57, -1000000.0 }
 0x302   : > { %v872_v62 = vsel %vm398_vm1, %v869_v61, -inf }
 0x303   : > { %873 = vmax.xlane.f32.xlu1 %v872_v62 }
 0x380   : > { %v591_v2 = vpop.xlane.xlu1 %590 }
 0x381   : > { %v592_v4 = vmax.f32 %v587_v3, %v591_v2 }
 0x383   : > { %v593_v8 = vsub.f32 %v587_v3, %v592_v4  ;;  %677 = vst.msk [vmem:[#allocation2] sm:$0xff] %vm609_vm6, %v592_v4  ;;  %598 = vperm.xlu1 %1342, %v592_v4   ;;  %v471_v4 = vld [vmem:[#allocation4] sm:$0xff] }
 0x385   : > { %v594_v35 = vmul.f32 1.442695, %v593_v8 }
 0x387   : > { %622 = vrot.lane.b32.xlu1 %v1217_v5, %s1404_s8 }
 0x388   : > { %v734_v6 = vpop.xlane.xlu0 %733  ;;  %1344 = vset.pattern.permute.xlu1 %v1409_v7 }
 0x38a   : > { %v1570_v9 = vld [vmem:[#allocation2] sm:$0xff] }
 0x38b   : > { %v1573_v10 = vmax.f32 %v1570_v9, %v734_v6 }
 0x38d   : > { %v736_v11 = vsub.f32 %v1570_v9, %v1573_v10  ;;  %817 = vst.msk [vmem:[#allocation2] sm:$0xff] %vm752_vm7, %v1573_v10  ;;  %741 = vperm.xlu0 %1343, %v1573_v10  }
 0x38f   : > { %v737_v18 = vmul.f32 1.442695, %v736_v11 }
 0x390   : > { %v874_v12 = vpop.xlane.xlu1 %873 }
 0x391   : > { %1346 = vset.pattern.permute.xlu0 %v1407_v63 }
 0x394   : > { %v1581_v13 = vld [vmem:[#allocation2] sm:$0xff] }
 0x395   : > { %v1584_v14 = vmax.f32 %v1581_v13, %v874_v12 }
 0x397   : > { %v876_v16 = vsub.f32 %v1581_v13, %v1584_v14  ;;  %957 = vst.msk [vmem:[#allocation2] sm:$0xff] %vm892_vm8, %v1584_v14  ;;  %881 = vperm.xlu1 %1344, %v1584_v14  }
 0x399   : > { %v877_v56 = vmul.f32 1.442695, %v876_v16 }
 0x39b   : > { %762 = vrot.lane.b32.xlu1 %v1217_v5, %s1405_s9  ;;  %s368_s9 = scalar_lea.vmem %s1669_s6, %s1207_s25 }
 0x39c   : > { %1345 = vset.pattern.permute.xlu1 %v1403_v15 }
 0x39f   : > { %902 = vrot.lane.b32.xlu1 %v1217_v5, %s1406_s10 }
 0x3c3   : > { %466 = vadd.xlane.f32.xlu1 %v465_v17 }
 0x402   : > { %v599_v19 = vpop.permute.xlu1 %598 }
 0x403   : > { %v601_v22 = vsub.f32 %v586_v47, %v599_v19 }
 0x405   : > { %v602_v23 = vmul.f32 1.442695, %v601_v22 }
 0x406   : > { %v623_v24 = vpop.permute.xlu1 %622 }
 0x407   : > { %1360 = vpow2.f32 %v602_v23  ;;  %v628_v25 = vsel %vm482_vm5, %v623_v24, 0 }
 0x408   : > { %1267 = vmatpush3.bf16.msra.mxu0 %v628_v25 }
 0x409   : > { %1278 = vmatprep.subr.bf16.mxu0 %v1400_v0 }
 0x40c   : > { %v742_v26 = vpop.permute.xlu0 %741 }
 0x40d   : > { %v744_v27 = vsub.f32 %v729_v54, %v742_v26 }
 0x40f   : > { %v745_v28 = vmul.f32 1.442695, %v744_v27 }
 0x411   : > { %v1361_v30 = vpop.eup %1360  ;;  %1362 = vpow2.f32 %v745_v28 }
 0x412   : > { %v605_v31 = vsel %vm398_vm1, %v1361_v30, 0.0  ;;  %v618_v32 = vpack.c.bf16 %v1361_v30, %v1361_v30 }
 0x413   : > { %606 = vadd.xlane.f32.xlu0 %v605_v31 }
 0x414   : > { %1269 = vmatmul.mubr.msk.bf16.vlgmr.msra.gmra.mrb[4].mxu0 %vm398_vm1, %v618_v32 }
 0x415   : > { %1280 = vmatprep.mubr.msk.bf16.mxu0 %vm1401_vm0, %v1400_v0 }
 0x416   : > { %v882_v29 = vpop.permute.xlu1 %881 }
 0x417   : > { %v884_v33 = vsub.f32 %v869_v61, %v882_v29 }
 0x419   : > { %v885_v34 = vmul.f32 1.442695, %v884_v33 }
 0x41a   : > { %v763_v36 = vpop.permute.xlu1 %762 }
 0x41b   : > { %v1363_v37 = vpop.eup %1362  ;;  %1364 = vpow2.f32 %v885_v34  ;;  %v768_v39 = vsel %vm482_vm5, %v763_v36, 0 }
 0x41c   : > { %1279 = vmatpush3.bf16.msra.mxu0 %v768_v39  ;;  %v748_v40 = vsel %vm398_vm1, %v1363_v37, 0.0  ;;  %v761_v41 = vpack.c.bf16 %v1363_v37, %v1363_v37  ;;  %1366 = vpow2.f32 %v594_v35 }
 0x41d   : > { %749 = vadd.xlane.f32.xlu1 %v748_v40  ;;  %1290 = vmatprep.subr.bf16.mxu0 %v1400_v0  ;;  %1368 = vpow2.f32 %v454_v48 }
 0x41e   : > { %v903_v42 = vpop.permute.xlu1 %902  ;;  %1370 = vpow2.f32 %v737_v18 }
 0x41f   : > { %1281 = vmatmul.mubr.msk.bf16.vlgmr.msra.gmra.mrb[8].mxu0 %vm398_vm1, %v761_v41  ;;  %v908_v43 = vsel %vm482_vm5, %v903_v42, 0  ;;  %1372 = vpow2.f32 %v877_v56 }
 0x420   : > { %1291 = vmatpush3.bf16.msra.mxu0 %v908_v43  ;;  %1292 = vmatprep.mubr.msk.bf16.mxu0 %vm1401_vm0, %v1400_v0  ;;  %vm1007_vm0 = vcmask 257216  }
 0x425   : > { %v1365_v44 = vpop.eup %1364 }
 0x426   : > { %v888_v45 = vsel %vm398_vm1, %v1365_v44, 0.0  ;;  %v901_v46 = vpack.c.bf16 %v1365_v44, %v1365_v44  ;;  %v1367_v47 = vpop.eup %1366 }
 0x427   : > { %889 = vadd.xlane.f32.xlu1 %v888_v45  ;;  %v1369_v49 = vpop.eup %1368 }
 0x428   : > { %1293 = vmatmul.mubr.msk.bf16.vlgmr.msra.gmra.mrb[12].mxu0 %vm398_vm1, %v901_v46  ;;  %v464_v51 = vmul.f32 %v1369_v49, %v448_v50  ;;  %v1371_v57 = vpop.eup %1370 }
 0x429   : > { %614 = vperm.xlu0 %1346, %v1367_v47   ;;  %v1373_v2 = vpop.eup %1372 }
 0x42d   : > { %1353 = vset.pattern.permute.xlu0 %v1409_v7 }
 0x438   : > { %474 = vperm.xlu1 %1345, %v1369_v49  }
 0x43c   : > { %1347 = vset.pattern.permute.xlu1 %v1408_v1 }
 0x450   : > { %v467_v52 = vpop.xlane.xlu1 %466 }
 0x451   : > { %v468_v53 = vadd.f32 %v467_v52, %v464_v51 }
 0x453   : > { %470 = vst.msk [vmem:[#allocation3] sm:$0xff] %vm469_vm4, %v468_v53 }
 0x45a   : > { %v588_v20 = vld [vmem:[#allocation3] sm:$0xff] }
 0x45b   : > { %v604_v21 = vmul.f32 %v1367_v47, %v588_v20  ;;  %v1223_v20 = vld [vmem:[%s1668_s5] ss:$0 sm:$0xff] }
 0x4a0   : > { %v607_v54 = vpop.xlane.xlu0 %606 }
 0x4a1   : > { %v608_v55 = vadd.f32 %v607_v54, %v604_v21  ;;  %v1077_v54 = vld [vmem:[%s340_s28] sm:$0xff] }
 0x4a3   : > { %610 = vst.msk [vmem:[#allocation3] sm:$0xff] %vm609_vm6, %v608_v55 }
 0x4a8   : > { %v615_v30 = vpop.permute.xlu0 %614 }
 0x4aa   : > { %v731_v58 = vld [vmem:[#allocation3] sm:$0xff]  ;;  %v750_v60 = vpop.xlane.xlu1 %749 }
 0x4ab   : > { %v747_v59 = vmul.f32 %v1371_v57, %v731_v58 }
 0x4ad   : > { %v751_v61 = vadd.f32 %v750_v60, %v747_v59 }
 0x4af   : > { %753 = vst.msk [vmem:[#allocation3] sm:$0xff] %vm752_vm7, %v751_v61 }
 0x4b4   : > { %v890_v62 = vpop.xlane.xlu1 %889 }
 0x4b6   : > { %v871_v3 = vld [vmem:[#allocation3] sm:$0xff] }
 0x4b7   : > { %v887_v5 = vmul.f32 %v1373_v2, %v871_v3 }
 0x4b8   : > { %v475_v8 = vpop.permute.xlu1 %474 }
 0x4b9   : > { %v891_v6 = vadd.f32 %v890_v62, %v887_v5  ;;  %v477_v9 = vmul.f32 %v475_v8, %v471_v4 }
 0x4bb   : > { %893 = vst.msk [vmem:[#allocation3] sm:$0xff] %vm892_vm8, %v891_v6  ;;  %v526_v10 = vadd.f32 %v1549_v38, %v477_v9 }
 0x4bd   : > { %527 = vst.msk [vmem:[#allocation4] sm:$0xff] %vm398_vm1, %v526_v10 }
 0x4c2   : > { %v961_v16 = vld [vmem:[#allocation3] sm:$0xff] }
 0x4c3   : > { %1374 = vrcp.f32 %v961_v16 }
 0x4c4   : > { %v611_v28 = vld [vmem:[#allocation4] sm:$0xff] }
 0x4c5   : > { %v617_v31 = vmul.f32 %v615_v30, %v611_v28 }
 0x4cd   : > { %v1375_v23 = vpop.eup %1374 }
 0x4e7   : > { %v664_v11 = vpop.f32.mrb[4].mxu0 }
 0x4e8   : > { %671 = vrot.lane.b32.xlu1 %v664_v11, %s1410_s14  ;;  %v1270_v12 = vpop.f32.mrb[5].mxu0 }
 0x4e9   : > { %v667_v13 = vpop.f32.mrb[6].mxu0 }
 0x4ea   : > { %v1271_v14 = vpop.f32.mrb[7].mxu0 }
 0x4ec   : > { %757 = vperm.xlu1 %1347, %v1371_v57  }
 0x4f0   : > { %1348 = vset.pattern.permute.xlu1 %v1409_v7 }
 0x4f1   : > { %897 = vperm.xlu1 %1348, %v1373_v2  }
 0x4f2   : > { %v804_v17 = vpop.f32.mrb[8].mxu0 }
 0x4f3   : > { %v1282_v19 = vpop.f32.mrb[9].mxu0 }
 0x4f4   : > { %v807_v22 = vpop.f32.mrb[10].mxu0 }
 0x4f5   : > { %811 = vrot.lane.b32.xlu1 %v804_v17, %s1411_s15  ;;  %v1283_v38 = vpop.f32.mrb[11].mxu0 }
 0x4f6   : > { %1349 = vset.pattern.permute.xlu1 %v1403_v15  ;;  %v1356_v15 = vld [vmem:[%s1667_s4] sm:$0xff]  }
 0x4f7   : > { %1297 = vmatpush3.bf16.msra.mxu1 %v1356_v15 }
 0x4f8   : > { %1298 = vmatprep.subr.bf16.mxu1 %v1400_v0 }
 0x4f9   : > { %966 = vperm.xlu1 %1349, %v1375_v23  }
 0x4fb   : > { %v944_v24 = vpop.f32.mrb[12].mxu0 }
 0x4fc   : > { %v1294_v25 = vpop.f32.mrb[13].mxu0 }
 0x4fd   : > { %1350 = vset.pattern.permute.xlu1 %v1407_v63  ;;  %v947_v26 = vpop.f32.mrb[14].mxu0  ;;  %v1357_v63 = vld [vmem:[%s1667_s4 + $0x8] sm:$0xff]  }
 0x4fe   : > { %978 = vperm.xlu1 %1350, %v1375_v23   ;;  %v1295_v27 = vpop.f32.mrb[15].mxu0  ;;  %1299 = vmatpush3.bf16.msra.mxu1 %v1357_v63 }
 0x502   : > { %951 = vrot.lane.b32.xlu1 %v944_v24, %s1412_s16 }
 0x503   : > { %1351 = vset.pattern.permute.xlu1 %v1408_v1 }
 0x506   : > { %990 = vperm.xlu1 %1351, %v1375_v23  }
 0x50a   : > { %1352 = vset.pattern.permute.xlu1 %v1409_v7 }
 0x50b   : > { %1002 = vperm.xlu1 %1352, %v1375_v23  }
 0x55a   : > { %v672_v1 = vpop.permute.xlu1 %671 }
 0x55b   : > { %v674_v32 = vadd.f32 %v672_v1, %v617_v31 }
 0x55d   : > { %676 = vst.msk [vmem:[#allocation4] sm:$0xff] %vm675_vm10, %v674_v32 }
 0x564   : > { %v754_v33 = vld [vmem:[#allocation4] sm:$0xff] }
 0x56b   : > { %v758_v7 = vpop.permute.xlu1 %757 }
 0x56c   : > { %v760_v34 = vmul.f32 %v758_v7, %v754_v33 }
 0x570   : > { %v898_v29 = vpop.permute.xlu1 %897 }
 0x574   : > { %v812_v35 = vpop.permute.xlu1 %811 }
 0x575   : > { %v814_v36 = vadd.f32 %v812_v35, %v760_v34 }
 0x577   : > { %816 = vst.msk [vmem:[#allocation4] sm:$0xff] %vm815_vm11, %v814_v36 }
 0x578   : > { %v967_v37 = vpop.permute.xlu1 %966 }
 0x57d   : > { %v979_v39 = vpop.permute.xlu1 %978 }
 0x57e   : > { %v894_v40 = vld [vmem:[#allocation4] sm:$0xff] }
 0x57f   : > { %v900_v0 = vmul.f32 %v898_v29, %v894_v40 }
 0x581   : > { %v952_v41 = vpop.permute.xlu1 %951 }
 0x582   : > { %v954_v42 = vadd.f32 %v952_v41, %v900_v0 }
 0x584   : > { %956 = vst.msk [vmem:[#allocation4] sm:$0xff] %vm955_vm12, %v954_v42 }
 0x585   : > { %v991_v43 = vpop.permute.xlu1 %990 }
 0x58a   : > { %v1003_v44 = vpop.permute.xlu1 %1002 }
 0x58b   : > { %v963_v45 = vld [vmem:[#allocation4] sm:$0xff] }
 0x58c   : > { %v969_v46 = vmul.f32 %v967_v37, %v963_v45  ;;  %v981_v47 = vmul.f32 %v979_v39, %v963_v45  ;;  %v993_v48 = vmul.f32 %v991_v43, %v963_v45  ;;  %v1005_v49 = vmul.f32 %v1003_v44, %v963_v45 }
 0x58e   : > { %v970_v50 = vpack.c.bf16 %v969_v46, %v969_v46  ;;  %v982_v51 = vpack.c.bf16 %v981_v47, %v981_v47  ;;  %v994_v52 = vpack.c.bf16 %v993_v48, %v993_v48  ;;  %v1006_v53 = vpack.c.bf16 %v1005_v49, %v1005_v49 }
 0x590   : > { %972 = vst.msk [vmem:[#allocation5] sm:$0xf] %vm971_vm13, %v970_v50 }
 0x591   : > { %984 = vst.msk [vmem:[#allocation5] sm:$0xf] %vm983_vm14, %v982_v51 }
 0x592   : > { %996 = vst.msk [vmem:[#allocation5] sm:$0xf] %vm995_vm15, %v994_v52 }
 0x593   : > { %1008 = vst.msk [vmem:[#allocation5] sm:$0xf] %vm1007_vm0, %v1006_v53 }
 0x59a   : > { %v1009_v18 = vld [vmem:[#allocation5] sm:$0xf] }
 0x59b   : > { %1301 = vmatmul.mubr.msk.bf16.vlgmr.msra.gmra.mrb[16].mxu1 %vm377_vm9, %v1009_v18 }
 0x66e   : > { %v1071_v21 = vpop.f32.mrb[16].mxu1 }
 0x66f   : > { %v1072_v55 = vadd.f32 %v1223_v20, %v1071_v21  ;;  %v1302_v56 = vpop.f32.mrb[17].mxu1 }
 0x670   : > { %v1074_v57 = vpop.f32.mrb[18].mxu1 }
 0x671   : > { %v1078_v58 = vadd.f32 %v1077_v54, %v1072_v55  ;;  %v1303_v59 = vpop.f32.mrb[19].mxu1 }
 0x673   : > { %1079 = vst.msk [vmem:[%s368_s9] sm:$0xff] %vm377_vm9, %v1078_v58 }
 0x674 PF: > { %s16_s23 = sadd.s32 1, %s1398_s23   ;;  %s1670_s21 = smov %s1394_s22 }
 0x675   : > { %p13_p5 = scmp.ge.s32.totalorder %s16_s23, 4   ;;  %s1671_s22 = smov %s1673_s24 }
 0x677   :  { %15 = sbr.rel (!%p13_p5) target bundleno = 2 (0x2), region = 95 }

</bundles_post_ra>
